<compile_context>
chip_gen: v7x
topology: tpu7x:2x2x1
jax: 0.10.0
libtpu: 0.0.40
codegen_flags: <defaults>
</compile_context>

<pallas_src>
import jax
import jax.numpy as jnp
from jax import lax
from jax.experimental import pallas as pl
from jax.experimental.pallas import tpu as pltpu

# bf16 halves the pre-BN activation HBM round trip (biggest win on v5e/v6e);
# switch to jnp.float32 for bit-closer BatchNorm application.
INTERMEDIATE_DTYPE = jnp.bfloat16


def _fused_conv_unpool_kernel(xp_ref, rel_ref, wc_ref,
                              y_ref, sum_ref, sumsq_ref, slab_ref):
    """Per batch-block: fused transposed convs + bottleneck + 1x1-conv +
    MaxUnpool1d(3,1,1) in ONE matmul, plus partial BatchNorm statistics."""
    nb, cpad, lp = xp_ref.shape          # (Nb, Cpad, L + 2P) bf16
    coutp = wc_ref.shape[0] // 2
    kcp = wc_ref.shape[1]                # Kmax * Cpad
    kmax = kcp // cpad
    nbl = slab_ref.shape[1]              # Nb * L
    L = nbl // nb

    # ---- im2col slab (bf16): row (s*Cpad + ci), column (n*L + t) = Xp[n, ci, s+t].
    # Cpad is a multiple of 16 so every row-block store is sublane-aligned.
    for n in range(nb):
        xpn = xp_ref[n]                  # (Cpad, Lp), loaded once per batch
        for s in range(kmax):
            slab_ref[s * cpad:(s + 1) * cpad, n * L:(n + 1) * L] = xpn[:, s:s + L]

    # ---- one MXU matmul: rows [0:Coutp] = bottleneck(cat(convT1..3)) output,
    #      rows [Coutp:2*Coutp] = conv_to_maxpool (1x1) output.
    acc = jnp.dot(wc_ref[...], slab_ref[...],
                  preferred_element_type=jnp.float32)        # (2*Coutp, Nb*L)
    bn_pre = acc[:coutp, :]
    z4 = acc[coutp:, :]

    # ---- MaxUnpool1d(kernel=3, stride=1, padding=1) via 3-way shifted select.
    # rel[t] = idx[t] - t + 1 in {0,1,2}; output o receives from source t in
    # {o-1, o, o+1}.  Ascending-source select order keeps last-write-wins.
    # Valid MaxPool(3,1,1) indices never have rel==2 at t=L-1 nor rel==0 at t=0,
    # so the lane-wrap of the rolls (including across batch boundaries inside
    # the block) can never inject a spurious contribution -> no position mask.
    rel = rel_ref[0].astype(jnp.int32)                       # (Coutp, Nb*L)
    rel_m = pltpu.roll(rel, 1, 1)                            # rel at source o-1
    z4_m = pltpu.roll(z4, 1, 1)
    rel_p = pltpu.roll(rel, nbl - 1, 1)                      # rel at source o+1
    z4_p = pltpu.roll(z4, nbl - 1, 1)
    mup = jnp.where(rel_m == 2, z4_m, 0.0)
    mup = jnp.where(rel == 1, z4, mup)
    mup = jnp.where(rel_p == 0, z4_p, mup)

    y = bn_pre + mup                                          # (Coutp, Nb*L) f32
    y_ref[0] = y.astype(y_ref.dtype)

    # ---- per-channel partial BatchNorm statistics for this block (f32).
    sum_ref[0] = jnp.sum(y, axis=1, keepdims=True)
    sumsq_ref[0] = jnp.sum(y * y, axis=1, keepdims=True)


def _bn_relu_kernel(scale_ref, shift_ref, y_ref, o_ref):
    """Elementwise BatchNorm (precomputed scale/shift) + ReLU, lane-dense."""
    y = y_ref[...].astype(jnp.float32)
    o_ref[...] = jnp.maximum(y * scale_ref[...] + shift_ref[...], 0.0
                             ).astype(o_ref.dtype)


def _round_up(v, m):
    return ((v + m - 1) // m) * m


def _pick_batch_block(n, per_batch_bytes, target_bytes=4 << 20, max_nb=8):
    """Largest Nb dividing N that keeps the per-block working set modest
    (v7x: 64 MiB/TC budget) and leaves >= 2 grid steps so both TensorCores of a
    v7x chip / both megacore halves get work.  max_nb bounds the statically
    unrolled slab-build loop."""
    best = 1
    for nb in range(1, min(n, max_nb) + 1):
        if n % nb:
            continue
        if nb > 1 and nb * per_batch_bytes > target_bytes:
            break
        if n // nb >= 2 or n == 1:
            best = nb
    return best


def inception_transpose_forward(x, indices, params, *, batch_block=None):
    w1, w2, w3 = params["w1"], params["w2"], params["w3"]     # (Cin, BC, K)
    wmax, wb = params["wmax"], params["wb"]                   # (Cout,Cin,1), (Cout,3BC,1)
    gamma, beta = params["gamma"], params["beta"]             # (Cout,)

    N, Cin, L = x.shape
    Cout = wmax.shape[0]
    BC = w1.shape[1]
    ks = (w1.shape[2], w2.shape[2], w3.shape[2])
    Kmax = max(ks)
    P = Kmax // 2
    Lp = L + 2 * P
    Cpad = _round_up(Cin, 16)        # bf16 sublane packing -> aligned slab stores
    Coutp = _round_up(Cout, 8)       # f32 result sublane tile
    KCp = Kmax * Cpad

    # ---------------- host-side weight fusion (once per call) ----------------
    # ConvTranspose1d(stride=1, pad=p_k): Z_k[b,t] = sum_{ci,j} X[ci,t+p_k-j]*W_k[ci,b,j].
    # Fold the 1x1 bottleneck and collapse the three branches into ONE "same"
    # conv of width Kmax over the padded input Xp (flip + centre-pad per branch).
    wb2 = wb[:, :, 0].astype(jnp.float32)

    def fuse(w_k, wb_slice):
        fw = jnp.einsum('ob,cbk->ock', wb_slice, w_k.astype(jnp.float32))
        pk = w_k.shape[2] // 2
        return jnp.pad(fw[:, :, ::-1], ((0, 0), (0, 0), (P - pk, P - pk)))

    w_all = (fuse(w1, wb2[:, :BC]) + fuse(w2, wb2[:, BC:2 * BC])
             + fuse(w3, wb2[:, 2 * BC:]))                                   # (Cout, Cin, Kmax)
    w_all = jnp.pad(w_all, ((0, Coutp - Cout), (0, Cpad - Cin), (0, 0)))
    wc_bn = jnp.transpose(w_all, (0, 2, 1)).reshape(Coutp, KCp)             # col = s*Cpad + ci

    # conv_to_maxpool (1x1) folded in as extra output rows: slab row-block s==P
    # is exactly Xp[:, P:P+L] == X, so wmax only occupies those columns.
    wc_mx = jnp.zeros((Coutp, Kmax, Cpad), jnp.float32)
    wc_mx = wc_mx.at[:Cout, P, :Cin].set(wmax[:, :, 0].astype(jnp.float32))
    wc_mx = wc_mx.reshape(Coutp, KCp)
    wc_big = jnp.concatenate([wc_bn, wc_mx], axis=0).astype(jnp.bfloat16)   # (2*Coutp, KCp)

    # ---------------- batch blocking -----------------------------------------
    per_batch_bytes = (Cpad * Lp * 2 + Coutp * L * 3
                       + Kmax * Cpad * L * 2 + 2 * Coutp * L * 4)
    Nb = batch_block or _pick_batch_block(N, per_batch_bytes)
    # TODO(synk): support non-divisible N via a cdiv grid + masked tail block.
    assert N % Nb == 0
    nblocks = N // Nb
    NbL = Nb * L

    # ---------------- input prep ----------------------------------------------
    x_pad = jnp.pad(x, ((0, 0), (0, Cpad - Cin), (P, P))).astype(jnp.bfloat16)  # (N,Cpad,Lp)

    t_idx = jnp.arange(L, dtype=jnp.int32)
    rel = indices.astype(jnp.int32) - t_idx[None, None, :] + 1                  # in {0,1,2}
    rel_blk = (rel.reshape(nblocks, Nb, Cout, L)
                  .transpose(0, 2, 1, 3)
                  .reshape(nblocks, Cout, NbL))
    rel_blk = jnp.pad(rel_blk, ((0, 0), (0, Coutp - Cout), (0, 0)),
                      constant_values=3).astype(jnp.int8)                       # 4x less DMA

    cparams = pltpu.CompilerParams(
        dimension_semantics=("parallel",),      # feed both TCs (megacore / v7x)
        vmem_limit_bytes=48 * 1024 * 1024,      # fits v7x's 64 MiB/TC with headroom
    )

    y_blk, bn_sum, bn_sumsq = pl.pallas_call(
        _fused_conv_unpool_kernel,
        out_shape=(jax.ShapeDtypeStruct((nblocks, Coutp, NbL), INTERMEDIATE_DTYPE),
                   jax.ShapeDtypeStruct((nblocks, Coutp, 1), jnp.float32),
                   jax.ShapeDtypeStruct((nblocks, Coutp, 1), jnp.float32)),
        grid=(nblocks,),
        in_specs=[
            pl.BlockSpec((Nb, Cpad, Lp), lambda b: (b, 0, 0)),
            pl.BlockSpec((1, Coutp, NbL), lambda b: (b, 0, 0)),
            pl.BlockSpec((2 * Coutp, KCp), lambda b: (0, 0)),   # resident weights
        ],
        out_specs=[
            pl.BlockSpec((1, Coutp, NbL), lambda b: (b, 0, 0)),
            pl.BlockSpec((1, Coutp, 1), lambda b: (b, 0, 0)),
            pl.BlockSpec((1, Coutp, 1), lambda b: (b, 0, 0)),
        ],
        scratch_shapes=[pltpu.VMEM((KCp, NbL), jnp.bfloat16)],   # bf16 im2col slab
        compiler_params=cparams,
    )(x_pad, rel_blk, wc_big)

    # -------- BatchNorm scale/shift: tiny host-side reduction of partials -----
    cnt = float(N * L)
    s1 = jnp.sum(bn_sum[:, :, 0], axis=0)
    s2 = jnp.sum(bn_sumsq[:, :, 0], axis=0)
    mean = s1 / cnt
    var = jnp.maximum(s2 / cnt - mean * mean, 0.0)   # biased var; clamp cancellation
    gamma_p = jnp.pad(gamma.astype(jnp.float32), (0, Coutp - Cout), constant_values=1.0)
    beta_p = jnp.pad(beta.astype(jnp.float32), (0, Coutp - Cout))
    scale_v = gamma_p * lax.rsqrt(var + 1e-5)
    shift_v = beta_p - mean * scale_v
    scale3 = scale_v.reshape(1, Coutp, 1)
    shift3 = shift_v.reshape(1, Coutp, 1)

    out_blk = pl.pallas_call(
        _bn_relu_kernel,
        out_shape=jax.ShapeDtypeStruct((nblocks, Coutp, NbL), jnp.float32),
        grid=(nblocks,),
        in_specs=[
            pl.BlockSpec((1, Coutp, 1), lambda b: (0, 0, 0)),
            pl.BlockSpec((1, Coutp, 1), lambda b: (0, 0, 0)),
            pl.BlockSpec((1, Coutp, NbL), lambda b: (b, 0, 0)),
        ],
        out_specs=pl.BlockSpec((1, Coutp, NbL), lambda b: (b, 0, 0)),
        compiler_params=pltpu.CompilerParams(dimension_semantics=("parallel",)),
    )(scale3, shift3, y_blk)

    # Restore the module's (N, Cout, L) layout (wrapper-side layout plumbing).
    out = (out_blk.reshape(nblocks, Coutp, Nb, L)
                  .transpose(0, 2, 1, 3)
                  .reshape(N, Coutp, L)[:, :Cout, :])
    return out


if __name__ == "__main__":
    key = jax.random.PRNGKey(0)
    N, Cin, Cout, BC, L = 4, 4, 8, 32, 64
    ks = (9, 19, 39)

    k_x, k1, k2, k3, k4, k5, k6 = jax.random.split(key, 7)
    x = jax.random.normal(k_x, (N, Cin, L), jnp.float32)

    params = dict(
        # nn.ConvTranspose1d weight shape: (in_channels, out_channels, K)
        w1=0.1 * jax.random.normal(k1, (Cin, BC, ks[0]), jnp.float32),
        w2=0.1 * jax.random.normal(k2, (Cin, BC, ks[1]), jnp.float32),
        w3=0.1 * jax.random.normal(k3, (Cin, BC, ks[2]), jnp.float32),
        # nn.Conv1d weight shapes: (out_channels, in_channels, 1)
        wmax=0.1 * jax.random.normal(k4, (Cout, Cin, 1), jnp.float32),
        wb=0.1 * jax.random.normal(k5, (Cout, 3 * BC, 1), jnp.float32),
        # BatchNorm1d affine params (PyTorch default init)
        gamma=jnp.ones((Cout,), jnp.float32),
        beta=jnp.zeros((Cout,), jnp.float32),
    )

    # Valid MaxPool1d(kernel=3, stride=1, padding=1, return_indices=True)
    # indices built from a deterministic random tensor (PyTorch semantics:
    # spatial index into the unpooled signal per (n, c)).
    r = jax.random.normal(k6, (N, Cout, L), jnp.float32)
    rp = jnp.pad(r, ((0, 0), (0, 0), (1, 1)), constant_values=-jnp.inf)
    win = jnp.stack([rp[..., 0:L], rp[..., 1:L + 1], rp[..., 2:L + 2]], axis=-1)
    rel = jnp.argmax(win, axis=-1).astype(jnp.int32)
    indices = jnp.arange(L, dtype=jnp.int32)[None, None, :] - 1 + rel

    out = inception_transpose_forward(x, indices, params)
    jax.block_until_ready(out)
    assert out.shape == (N, Cout, L) and out.dtype == jnp.float32
    print("KERNEL_OK")
</pallas_src>

<mosaic_0001>
module attributes {stable_mosaic.version = 11 : i64} {
  func.func @_fused_conv_unpool_kernel(%arg0: i32, %arg1: memref<2x16x102xbf16, #tpu.memory_space<vmem>>, %arg2: memref<1x8x128xi8, #tpu.memory_space<vmem>>, %arg3: memref<16x624xbf16, #tpu.memory_space<vmem>>, %arg4: memref<1x8x128xbf16, #tpu.memory_space<vmem>>, %arg5: memref<1x8x1xf32, #tpu.memory_space<vmem>>, %arg6: memref<1x8x1xf32, #tpu.memory_space<vmem>>, %arg7: memref<624x128xbf16, #tpu.memory_space<vmem>>) attributes {dimension_semantics = [#tpu.dimension_semantics<parallel>], iteration_bounds = array<i64: 2>, scalar_prefetch = 0 : i64, scratch_operands = 1 : i64, tpu.core_type = #tpu.core_type<tc>, window_params = [{transform_indices = @transform_0, window_bounds = array<i64: 2, 16, 102>}, {transform_indices = @transform_1, window_bounds = array<i64: 1, 8, 128>}, {pipeline_mode = #tpu.pipeline_mode<synchronous>, transform_indices = @transform_2, window_bounds = array<i64: 16, 624>}, {transform_indices = @transform_3, window_bounds = array<i64: 1, 8, 128>}, {transform_indices = @transform_4, window_bounds = array<i64: 1, 8, 1>}, {transform_indices = @transform_5, window_bounds = array<i64: 1, 8, 1>}]} {
    %c0 = arith.constant 0 : index
    %c0_0 = arith.constant 0 : index
    %c0_1 = arith.constant 0 : index
    %0 = vector.load %arg1[%c0, %c0_0, %c0_1] : memref<2x16x102xbf16, #tpu.memory_space<vmem>>, vector<1x16x102xbf16>
    %1 = vector.shape_cast %0 : vector<1x16x102xbf16> to vector<16x102xbf16>
    %2 = vector.extract_strided_slice %1 {offsets = [0, 0], sizes = [16, 64], strides = [1, 1]} : vector<16x102xbf16> to vector<16x64xbf16>
    %c0_2 = arith.constant 0 : index
    %c0_3 = arith.constant 0 : index
    %3 = vector.load %arg7[%c0_2, %c0_3] : memref<624x128xbf16, #tpu.memory_space<vmem>>, vector<16x64xbf16>
    tpu.vector_store %arg7[%c0_2, %c0_3], %2 {strides = array<i32>} : memref<624x128xbf16, #tpu.memory_space<vmem>>, vector<16x64xbf16>,
    %4 = vector.extract_strided_slice %1 {offsets = [0, 1], sizes = [16, 64], strides = [1, 1]} : vector<16x102xbf16> to vector<16x64xbf16>
    %c16 = arith.constant 16 : index
    %c0_4 = arith.constant 0 : index
    %5 = vector.load %arg7[%c16, %c0_4] : memref<624x128xbf16, #tpu.memory_space<vmem>>, vector<16x64xbf16>
    tpu.vector_store %arg7[%c16, %c0_4], %4 {strides = array<i32>} : memref<624x128xbf16, #tpu.memory_space<vmem>>, vector<16x64xbf16>,
    %6 = vector.extract_strided_slice %1 {offsets = [0, 2], sizes = [16, 64], strides = [1, 1]} : vector<16x102xbf16> to vector<16x64xbf16>
    %c32 = arith.constant 32 : index
    %c0_5 = arith.constant 0 : index
    %7 = vector.load %arg7[%c32, %c0_5] : memref<624x128xbf16, #tpu.memory_space<vmem>>, vector<16x64xbf16>
    tpu.vector_store %arg7[%c32, %c0_5], %6 {strides = array<i32>} : memref<624x128xbf16, #tpu.memory_space<vmem>>, vector<16x64xbf16>,
    %8 = vector.extract_strided_slice %1 {offsets = [0, 3], sizes = [16, 64], strides = [1, 1]} : vector<16x102xbf16> to vector<16x64xbf16>
    %c48 = arith.constant 48 : index
    %c0_6 = arith.constant 0 : index
    %9 = vector.load %arg7[%c48, %c0_6] : memref<624x128xbf16, #tpu.memory_space<vmem>>, vector<16x64xbf16>
    tpu.vector_store %arg7[%c48, %c0_6], %8 {strides = array<i32>} : memref<624x128xbf16, #tpu.memory_space<vmem>>, vector<16x64xbf16>,
    %10 = vector.extract_strided_slice %1 {offsets = [0, 4], sizes = [16, 64], strides = [1, 1]} : vector<16x102xbf16> to vector<16x64xbf16>
    %c64 = arith.constant 64 : index
    %c0_7 = arith.constant 0 : index
    %11 = vector.load %arg7[%c64, %c0_7] : memref<624x128xbf16, #tpu.memory_space<vmem>>, vector<16x64xbf16>
    tpu.vector_store %arg7[%c64, %c0_7], %10 {strides = array<i32>} : memref<624x128xbf16, #tpu.memory_space<vmem>>, vector<16x64xbf16>,
    %12 = vector.extract_strided_slice %1 {offsets = [0, 5], sizes = [16, 64], strides = [1, 1]} : vector<16x102xbf16> to vector<16x64xbf16>
    %c80 = arith.constant 80 : index
    %c0_8 = arith.constant 0 : index
    %13 = vector.load %arg7[%c80, %c0_8] : memref<624x128xbf16, #tpu.memory_space<vmem>>, vector<16x64xbf16>
    tpu.vector_store %arg7[%c80, %c0_8], %12 {strides = array<i32>} : memref<624x128xbf16, #tpu.memory_space<vmem>>, vector<16x64xbf16>,
    %14 = vector.extract_strided_slice %1 {offsets = [0, 6], sizes = [16, 64], strides = [1, 1]} : vector<16x102xbf16> to vector<16x64xbf16>
    %c96 = arith.constant 96 : index
    %c0_9 = arith.constant 0 : index
    %15 = vector.load %arg7[%c96, %c0_9] : memref<624x128xbf16, #tpu.memory_space<vmem>>, vector<16x64xbf16>
    tpu.vector_store %arg7[%c96, %c0_9], %14 {strides = array<i32>} : memref<624x128xbf16, #tpu.memory_space<vmem>>, vector<16x64xbf16>,
    %16 = vector.extract_strided_slice %1 {offsets = [0, 7], sizes = [16, 64], strides = [1, 1]} : vector<16x102xbf16> to vector<16x64xbf16>
    %c112 = arith.constant 112 : index
    %c0_10 = arith.constant 0 : index
    %17 = vector.load %arg7[%c112, %c0_10] : memref<624x128xbf16, #tpu.memory_space<vmem>>, vector<16x64xbf16>
    tpu.vector_store %arg7[%c112, %c0_10], %16 {strides = array<i32>} : memref<624x128xbf16, #tpu.memory_space<vmem>>, vector<16x64xbf16>,
    %18 = vector.extract_strided_slice %1 {offsets = [0, 8], sizes = [16, 64], strides = [1, 1]} : vector<16x102xbf16> to vector<16x64xbf16>
    %c128 = arith.constant 128 : index
    %c0_11 = arith.constant 0 : index
    %19 = vector.load %arg7[%c128, %c0_11] : memref<624x128xbf16, #tpu.memory_space<vmem>>, vector<16x64xbf16>
    tpu.vector_store %arg7[%c128, %c0_11], %18 {strides = array<i32>} : memref<624x128xbf16, #tpu.memory_space<vmem>>, vector<16x64xbf16>,
    %20 = vector.extract_strided_slice %1 {offsets = [0, 9], sizes = [16, 64], strides = [1, 1]} : vector<16x102xbf16> to vector<16x64xbf16>
    %c144 = arith.constant 144 : index
    %c0_12 = arith.constant 0 : index
    %21 = vector.load %arg7[%c144, %c0_12] : memref<624x128xbf16, #tpu.memory_space<vmem>>, vector<16x64xbf16>
    tpu.vector_store %arg7[%c144, %c0_12], %20 {strides = array<i32>} : memref<624x128xbf16, #tpu.memory_space<vmem>>, vector<16x64xbf16>,
    %22 = vector.extract_strided_slice %1 {offsets = [0, 10], sizes = [16, 64], strides = [1, 1]} : vector<16x102xbf16> to vector<16x64xbf16>
    %c160 = arith.constant 160 : index
    %c0_13 = arith.constant 0 : index
    %23 = vector.load %arg7[%c160, %c0_13] : memref<624x128xbf16, #tpu.memory_space<vmem>>, vector<16x64xbf16>
    tpu.vector_store %arg7[%c160, %c0_13], %22 {strides = array<i32>} : memref<624x128xbf16, #tpu.memory_space<vmem>>, vector<16x64xbf16>,
    %24 = vector.extract_strided_slice %1 {offsets = [0, 11], sizes = [16, 64], strides = [1, 1]} : vector<16x102xbf16> to vector<16x64xbf16>
    %c176 = arith.constant 176 : index
    %c0_14 = arith.constant 0 : index
    %25 = vector.load %arg7[%c176, %c0_14] : memref<624x128xbf16, #tpu.memory_space<vmem>>, vector<16x64xbf16>
    tpu.vector_store %arg7[%c176, %c0_14], %24 {strides = array<i32>} : memref<624x128xbf16, #tpu.memory_space<vmem>>, vector<16x64xbf16>,
    %26 = vector.extract_strided_slice %1 {offsets = [0, 12], sizes = [16, 64], strides = [1, 1]} : vector<16x102xbf16> to vector<16x64xbf16>
    %c192 = arith.constant 192 : index
    %c0_15 = arith.constant 0 : index
    %27 = vector.load %arg7[%c192, %c0_15] : memref<624x128xbf16, #tpu.memory_space<vmem>>, vector<16x64xbf16>
    tpu.vector_store %arg7[%c192, %c0_15], %26 {strides = array<i32>} : memref<624x128xbf16, #tpu.memory_space<vmem>>, vector<16x64xbf16>,
    %28 = vector.extract_strided_slice %1 {offsets = [0, 13], sizes = [16, 64], strides = [1, 1]} : vector<16x102xbf16> to vector<16x64xbf16>
    %c208 = arith.constant 208 : index
    %c0_16 = arith.constant 0 : index
    %29 = vector.load %arg7[%c208, %c0_16] : memref<624x128xbf16, #tpu.memory_space<vmem>>, vector<16x64xbf16>
    tpu.vector_store %arg7[%c208, %c0_16], %28 {strides = array<i32>} : memref<624x128xbf16, #tpu.memory_space<vmem>>, vector<16x64xbf16>,
    %30 = vector.extract_strided_slice %1 {offsets = [0, 14], sizes = [16, 64], strides = [1, 1]} : vector<16x102xbf16> to vector<16x64xbf16>
    %c224 = arith.constant 224 : index
    %c0_17 = arith.constant 0 : index
    %31 = vector.load %arg7[%c224, %c0_17] : memref<624x128xbf16, #tpu.memory_space<vmem>>, vector<16x64xbf16>
    tpu.vector_store %arg7[%c224, %c0_17], %30 {strides = array<i32>} : memref<624x128xbf16, #tpu.memory_space<vmem>>, vector<16x64xbf16>,
    %32 = vector.extract_strided_slice %1 {offsets = [0, 15], sizes = [16, 64], strides = [1, 1]} : vector<16x102xbf16> to vector<16x64xbf16>
    %c240 = arith.constant 240 : index
    %c0_18 = arith.constant 0 : index
    %33 = vector.load %arg7[%c240, %c0_18] : memref<624x128xbf16, #tpu.memory_space<vmem>>, vector<16x64xbf16>
    tpu.vector_store %arg7[%c240, %c0_18], %32 {strides = array<i32>} : memref<624x128xbf16, #tpu.memory_space<vmem>>, vector<16x64xbf16>,
    %34 = vector.extract_strided_slice %1 {offsets = [0, 16], sizes = [16, 64], strides = [1, 1]} : vector<16x102xbf16> to vector<16x64xbf16>
    %c256 = arith.constant 256 : index
    %c0_19 = arith.constant 0 : index
    %35 = vector.load %arg7[%c256, %c0_19] : memref<624x128xbf16, #tpu.memory_space<vmem>>, vector<16x64xbf16>
    tpu.vector_store %arg7[%c256, %c0_19], %34 {strides = array<i32>} : memref<624x128xbf16, #tpu.memory_space<vmem>>, vector<16x64xbf16>,
    %36 = vector.extract_strided_slice %1 {offsets = [0, 17], sizes = [16, 64], strides = [1, 1]} : vector<16x102xbf16> to vector<16x64xbf16>
    %c272 = arith.constant 272 : index
    %c0_20 = arith.constant 0 : index
    %37 = vector.load %arg7[%c272, %c0_20] : memref<624x128xbf16, #tpu.memory_space<vmem>>, vector<16x64xbf16>
    tpu.vector_store %arg7[%c272, %c0_20], %36 {strides = array<i32>} : memref<624x128xbf16, #tpu.memory_space<vmem>>, vector<16x64xbf16>,
    %38 = vector.extract_strided_slice %1 {offsets = [0, 18], sizes = [16, 64], strides = [1, 1]} : vector<16x102xbf16> to vector<16x64xbf16>
    %c288 = arith.constant 288 : index
    %c0_21 = arith.constant 0 : index
    %39 = vector.load %arg7[%c288, %c0_21] : memref<624x128xbf16, #tpu.memory_space<vmem>>, vector<16x64xbf16>
    tpu.vector_store %arg7[%c288, %c0_21], %38 {strides = array<i32>} : memref<624x128xbf16, #tpu.memory_space<vmem>>, vector<16x64xbf16>,
    %40 = vector.extract_strided_slice %1 {offsets = [0, 19], sizes = [16, 64], strides = [1, 1]} : vector<16x102xbf16> to vector<16x64xbf16>
    %c304 = arith.constant 304 : index
    %c0_22 = arith.constant 0 : index
    %41 = vector.load %arg7[%c304, %c0_22] : memref<624x128xbf16, #tpu.memory_space<vmem>>, vector<16x64xbf16>
    tpu.vector_store %arg7[%c304, %c0_22], %40 {strides = array<i32>} : memref<624x128xbf16, #tpu.memory_space<vmem>>, vector<16x64xbf16>,
    %42 = vector.extract_strided_slice %1 {offsets = [0, 20], sizes = [16, 64], strides = [1, 1]} : vector<16x102xbf16> to vector<16x64xbf16>
    %c320 = arith.constant 320 : index
    %c0_23 = arith.constant 0 : index
    %43 = vector.load %arg7[%c320, %c0_23] : memref<624x128xbf16, #tpu.memory_space<vmem>>, vector<16x64xbf16>
    tpu.vector_store %arg7[%c320, %c0_23], %42 {strides = array<i32>} : memref<624x128xbf16, #tpu.memory_space<vmem>>, vector<16x64xbf16>,
    %44 = vector.extract_strided_slice %1 {offsets = [0, 21], sizes = [16, 64], strides = [1, 1]} : vector<16x102xbf16> to vector<16x64xbf16>
    %c336 = arith.constant 336 : index
    %c0_24 = arith.constant 0 : index
    %45 = vector.load %arg7[%c336, %c0_24] : memref<624x128xbf16, #tpu.memory_space<vmem>>, vector<16x64xbf16>
    tpu.vector_store %arg7[%c336, %c0_24], %44 {strides = array<i32>} : memref<624x128xbf16, #tpu.memory_space<vmem>>, vector<16x64xbf16>,
    %46 = vector.extract_strided_slice %1 {offsets = [0, 22], sizes = [16, 64], strides = [1, 1]} : vector<16x102xbf16> to vector<16x64xbf16>
    %c352 = arith.constant 352 : index
    %c0_25 = arith.constant 0 : index
    %47 = vector.load %arg7[%c352, %c0_25] : memref<624x128xbf16, #tpu.memory_space<vmem>>, vector<16x64xbf16>
    tpu.vector_store %arg7[%c352, %c0_25], %46 {strides = array<i32>} : memref<624x128xbf16, #tpu.memory_space<vmem>>, vector<16x64xbf16>,
    %48 = vector.extract_strided_slice %1 {offsets = [0, 23], sizes = [16, 64], strides = [1, 1]} : vector<16x102xbf16> to vector<16x64xbf16>
    %c368 = arith.constant 368 : index
    %c0_26 = arith.constant 0 : index
    %49 = vector.load %arg7[%c368, %c0_26] : memref<624x128xbf16, #tpu.memory_space<vmem>>, vector<16x64xbf16>
    tpu.vector_store %arg7[%c368, %c0_26], %48 {strides = array<i32>} : memref<624x128xbf16, #tpu.memory_space<vmem>>, vector<16x64xbf16>,
    %50 = vector.extract_strided_slice %1 {offsets = [0, 24], sizes = [16, 64], strides = [1, 1]} : vector<16x102xbf16> to vector<16x64xbf16>
    %c384 = arith.constant 384 : index
    %c0_27 = arith.constant 0 : index
    %51 = vector.load %arg7[%c384, %c0_27] : memref<624x128xbf16, #tpu.memory_space<vmem>>, vector<16x64xbf16>
    tpu.vector_store %arg7[%c384, %c0_27], %50 {strides = array<i32>} : memref<624x128xbf16, #tpu.memory_space<vmem>>, vector<16x64xbf16>,
    %52 = vector.extract_strided_slice %1 {offsets = [0, 25], sizes = [16, 64], strides = [1, 1]} : vector<16x102xbf16> to vector<16x64xbf16>
    %c400 = arith.constant 400 : index
    %c0_28 = arith.constant 0 : index
    %53 = vector.load %arg7[%c400, %c0_28] : memref<624x128xbf16, #tpu.memory_space<vmem>>, vector<16x64xbf16>
    tpu.vector_store %arg7[%c400, %c0_28], %52 {strides = array<i32>} : memref<624x128xbf16, #tpu.memory_space<vmem>>, vector<16x64xbf16>,
    %54 = vector.extract_strided_slice %1 {offsets = [0, 26], sizes = [16, 64], strides = [1, 1]} : vector<16x102xbf16> to vector<16x64xbf16>
    %c416 = arith.constant 416 : index
    %c0_29 = arith.constant 0 : index
    %55 = vector.load %arg7[%c416, %c0_29] : memref<624x128xbf16, #tpu.memory_space<vmem>>, vector<16x64xbf16>
    tpu.vector_store %arg7[%c416, %c0_29], %54 {strides = array<i32>} : memref<624x128xbf16, #tpu.memory_space<vmem>>, vector<16x64xbf16>,
    %56 = vector.extract_strided_slice %1 {offsets = [0, 27], sizes = [16, 64], strides = [1, 1]} : vector<16x102xbf16> to vector<16x64xbf16>
    %c432 = arith.constant 432 : index
    %c0_30 = arith.constant 0 : index
    %57 = vector.load %arg7[%c432, %c0_30] : memref<624x128xbf16, #tpu.memory_space<vmem>>, vector<16x64xbf16>
    tpu.vector_store %arg7[%c432, %c0_30], %56 {strides = array<i32>} : memref<624x128xbf16, #tpu.memory_space<vmem>>, vector<16x64xbf16>,
    %58 = vector.extract_strided_slice %1 {offsets = [0, 28], sizes = [16, 64], strides = [1, 1]} : vector<16x102xbf16> to vector<16x64xbf16>
    %c448 = arith.constant 448 : index
    %c0_31 = arith.constant 0 : index
    %59 = vector.load %arg7[%c448, %c0_31] : memref<624x128xbf16, #tpu.memory_space<vmem>>, vector<16x64xbf16>
    tpu.vector_store %arg7[%c448, %c0_31], %58 {strides = array<i32>} : memref<624x128xbf16, #tpu.memory_space<vmem>>, vector<16x64xbf16>,
    %60 = vector.extract_strided_slice %1 {offsets = [0, 29], sizes = [16, 64], strides = [1, 1]} : vector<16x102xbf16> to vector<16x64xbf16>
    %c464 = arith.constant 464 : index
    %c0_32 = arith.constant 0 : index
    %61 = vector.load %arg7[%c464, %c0_32] : memref<624x128xbf16, #tpu.memory_space<vmem>>, vector<16x64xbf16>
    tpu.vector_store %arg7[%c464, %c0_32], %60 {strides = array<i32>} : memref<624x128xbf16, #tpu.memory_space<vmem>>, vector<16x64xbf16>,
    %62 = vector.extract_strided_slice %1 {offsets = [0, 30], sizes = [16, 64], strides = [1, 1]} : vector<16x102xbf16> to vector<16x64xbf16>
    %c480 = arith.constant 480 : index
    %c0_33 = arith.constant 0 : index
    %63 = vector.load %arg7[%c480, %c0_33] : memref<624x128xbf16, #tpu.memory_space<vmem>>, vector<16x64xbf16>
    tpu.vector_store %arg7[%c480, %c0_33], %62 {strides = array<i32>} : memref<624x128xbf16, #tpu.memory_space<vmem>>, vector<16x64xbf16>,
    %64 = vector.extract_strided_slice %1 {offsets = [0, 31], sizes = [16, 64], strides = [1, 1]} : vector<16x102xbf16> to vector<16x64xbf16>
    %c496 = arith.constant 496 : index
    %c0_34 = arith.constant 0 : index
    %65 = vector.load %arg7[%c496, %c0_34] : memref<624x128xbf16, #tpu.memory_space<vmem>>, vector<16x64xbf16>
    tpu.vector_store %arg7[%c496, %c0_34], %64 {strides = array<i32>} : memref<624x128xbf16, #tpu.memory_space<vmem>>, vector<16x64xbf16>,
    %66 = vector.extract_strided_slice %1 {offsets = [0, 32], sizes = [16, 64], strides = [1, 1]} : vector<16x102xbf16> to vector<16x64xbf16>
    %c512 = arith.constant 512 : index
    %c0_35 = arith.constant 0 : index
    %67 = vector.load %arg7[%c512, %c0_35] : memref<624x128xbf16, #tpu.memory_space<vmem>>, vector<16x64xbf16>
    tpu.vector_store %arg7[%c512, %c0_35], %66 {strides = array<i32>} : memref<624x128xbf16, #tpu.memory_space<vmem>>, vector<16x64xbf16>,
    %68 = vector.extract_strided_slice %1 {offsets = [0, 33], sizes = [16, 64], strides = [1, 1]} : vector<16x102xbf16> to vector<16x64xbf16>
    %c528 = arith.constant 528 : index
    %c0_36 = arith.constant 0 : index
    %69 = vector.load %arg7[%c528, %c0_36] : memref<624x128xbf16, #tpu.memory_space<vmem>>, vector<16x64xbf16>
    tpu.vector_store %arg7[%c528, %c0_36], %68 {strides = array<i32>} : memref<624x128xbf16, #tpu.memory_space<vmem>>, vector<16x64xbf16>,
    %70 = vector.extract_strided_slice %1 {offsets = [0, 34], sizes = [16, 64], strides = [1, 1]} : vector<16x102xbf16> to vector<16x64xbf16>
    %c544 = arith.constant 544 : index
    %c0_37 = arith.constant 0 : index
    %71 = vector.load %arg7[%c544, %c0_37] : memref<624x128xbf16, #tpu.memory_space<vmem>>, vector<16x64xbf16>
    tpu.vector_store %arg7[%c544, %c0_37], %70 {strides = array<i32>} : memref<624x128xbf16, #tpu.memory_space<vmem>>, vector<16x64xbf16>,
    %72 = vector.extract_strided_slice %1 {offsets = [0, 35], sizes = [16, 64], strides = [1, 1]} : vector<16x102xbf16> to vector<16x64xbf16>
    %c560 = arith.constant 560 : index
    %c0_38 = arith.constant 0 : index
    %73 = vector.load %arg7[%c560, %c0_38] : memref<624x128xbf16, #tpu.memory_space<vmem>>, vector<16x64xbf16>
    tpu.vector_store %arg7[%c560, %c0_38], %72 {strides = array<i32>} : memref<624x128xbf16, #tpu.memory_space<vmem>>, vector<16x64xbf16>,
    %74 = vector.extract_strided_slice %1 {offsets = [0, 36], sizes = [16, 64], strides = [1, 1]} : vector<16x102xbf16> to vector<16x64xbf16>
    %c576 = arith.constant 576 : index
    %c0_39 = arith.constant 0 : index
    %75 = vector.load %arg7[%c576, %c0_39] : memref<624x128xbf16, #tpu.memory_space<vmem>>, vector<16x64xbf16>
    tpu.vector_store %arg7[%c576, %c0_39], %74 {strides = array<i32>} : memref<624x128xbf16, #tpu.memory_space<vmem>>, vector<16x64xbf16>,
    %76 = vector.extract_strided_slice %1 {offsets = [0, 37], sizes = [16, 64], strides = [1, 1]} : vector<16x102xbf16> to vector<16x64xbf16>
    %c592 = arith.constant 592 : index
    %c0_40 = arith.constant 0 : index
    %77 = vector.load %arg7[%c592, %c0_40] : memref<624x128xbf16, #tpu.memory_space<vmem>>, vector<16x64xbf16>
    tpu.vector_store %arg7[%c592, %c0_40], %76 {strides = array<i32>} : memref<624x128xbf16, #tpu.memory_space<vmem>>, vector<16x64xbf16>,
    %78 = vector.extract_strided_slice %1 {offsets = [0, 38], sizes = [16, 64], strides = [1, 1]} : vector<16x102xbf16> to vector<16x64xbf16>
    %c608 = arith.constant 608 : index
    %c0_41 = arith.constant 0 : index
    %79 = vector.load %arg7[%c608, %c0_41] : memref<624x128xbf16, #tpu.memory_space<vmem>>, vector<16x64xbf16>
    tpu.vector_store %arg7[%c608, %c0_41], %78 {strides = array<i32>} : memref<624x128xbf16, #tpu.memory_space<vmem>>, vector<16x64xbf16>,
    %c1 = arith.constant 1 : index
    %c0_42 = arith.constant 0 : index
    %c0_43 = arith.constant 0 : index
    %80 = vector.load %arg1[%c1, %c0_42, %c0_43] : memref<2x16x102xbf16, #tpu.memory_space<vmem>>, vector<1x16x102xbf16>
    %81 = vector.shape_cast %80 : vector<1x16x102xbf16> to vector<16x102xbf16>
    %82 = vector.extract_strided_slice %81 {offsets = [0, 0], sizes = [16, 64], strides = [1, 1]} : vector<16x102xbf16> to vector<16x64xbf16>
    %c0_44 = arith.constant 0 : index
    %c64_45 = arith.constant 64 : index
    %83 = vector.load %arg7[%c0_44, %c64_45] : memref<624x128xbf16, #tpu.memory_space<vmem>>, vector<16x64xbf16>
    tpu.vector_store %arg7[%c0_44, %c64_45], %82 {strides = array<i32>} : memref<624x128xbf16, #tpu.memory_space<vmem>>, vector<16x64xbf16>,
    %84 = vector.extract_strided_slice %81 {offsets = [0, 1], sizes = [16, 64], strides = [1, 1]} : vector<16x102xbf16> to vector<16x64xbf16>
    %c16_46 = arith.constant 16 : index
    %c64_47 = arith.constant 64 : index
    %85 = vector.load %arg7[%c16_46, %c64_47] : memref<624x128xbf16, #tpu.memory_space<vmem>>, vector<16x64xbf16>
    tpu.vector_store %arg7[%c16_46, %c64_47], %84 {strides = array<i32>} : memref<624x128xbf16, #tpu.memory_space<vmem>>, vector<16x64xbf16>,
    %86 = vector.extract_strided_slice %81 {offsets = [0, 2], sizes = [16, 64], strides = [1, 1]} : vector<16x102xbf16> to vector<16x64xbf16>
    %c32_48 = arith.constant 32 : index
    %c64_49 = arith.constant 64 : index
    %87 = vector.load %arg7[%c32_48, %c64_49] : memref<624x128xbf16, #tpu.memory_space<vmem>>, vector<16x64xbf16>
    tpu.vector_store %arg7[%c32_48, %c64_49], %86 {strides = array<i32>} : memref<624x128xbf16, #tpu.memory_space<vmem>>, vector<16x64xbf16>,
    %88 = vector.extract_strided_slice %81 {offsets = [0, 3], sizes = [16, 64], strides = [1, 1]} : vector<16x102xbf16> to vector<16x64xbf16>
    %c48_50 = arith.constant 48 : index
    %c64_51 = arith.constant 64 : index
    %89 = vector.load %arg7[%c48_50, %c64_51] : memref<624x128xbf16, #tpu.memory_space<vmem>>, vector<16x64xbf16>
    tpu.vector_store %arg7[%c48_50, %c64_51], %88 {strides = array<i32>} : memref<624x128xbf16, #tpu.memory_space<vmem>>, vector<16x64xbf16>,
    %90 = vector.extract_strided_slice %81 {offsets = [0, 4], sizes = [16, 64], strides = [1, 1]} : vector<16x102xbf16> to vector<16x64xbf16>
    %c64_52 = arith.constant 64 : index
    %c64_53 = arith.constant 64 : index
    %91 = vector.load %arg7[%c64_52, %c64_53] : memref<624x128xbf16, #tpu.memory_space<vmem>>, vector<16x64xbf16>
    tpu.vector_store %arg7[%c64_52, %c64_53], %90 {strides = array<i32>} : memref<624x128xbf16, #tpu.memory_space<vmem>>, vector<16x64xbf16>,
    %92 = vector.extract_strided_slice %81 {offsets = [0, 5], sizes = [16, 64], strides = [1, 1]} : vector<16x102xbf16> to vector<16x64xbf16>
    %c80_54 = arith.constant 80 : index
    %c64_55 = arith.constant 64 : index
    %93 = vector.load %arg7[%c80_54, %c64_55] : memref<624x128xbf16, #tpu.memory_space<vmem>>, vector<16x64xbf16>
    tpu.vector_store %arg7[%c80_54, %c64_55], %92 {strides = array<i32>} : memref<624x128xbf16, #tpu.memory_space<vmem>>, vector<16x64xbf16>,
    %94 = vector.extract_strided_slice %81 {offsets = [0, 6], sizes = [16, 64], strides = [1, 1]} : vector<16x102xbf16> to vector<16x64xbf16>
    %c96_56 = arith.constant 96 : index
    %c64_57 = arith.constant 64 : index
    %95 = vector.load %arg7[%c96_56, %c64_57] : memref<624x128xbf16, #tpu.memory_space<vmem>>, vector<16x64xbf16>
    tpu.vector_store %arg7[%c96_56, %c64_57], %94 {strides = array<i32>} : memref<624x128xbf16, #tpu.memory_space<vmem>>, vector<16x64xbf16>,
    %96 = vector.extract_strided_slice %81 {offsets = [0, 7], sizes = [16, 64], strides = [1, 1]} : vector<16x102xbf16> to vector<16x64xbf16>
    %c112_58 = arith.constant 112 : index
    %c64_59 = arith.constant 64 : index
    %97 = vector.load %arg7[%c112_58, %c64_59] : memref<624x128xbf16, #tpu.memory_space<vmem>>, vector<16x64xbf16>
    tpu.vector_store %arg7[%c112_58, %c64_59], %96 {strides = array<i32>} : memref<624x128xbf16, #tpu.memory_space<vmem>>, vector<16x64xbf16>,
    %98 = vector.extract_strided_slice %81 {offsets = [0, 8], sizes = [16, 64], strides = [1, 1]} : vector<16x102xbf16> to vector<16x64xbf16>
    %c128_60 = arith.constant 128 : index
    %c64_61 = arith.constant 64 : index
    %99 = vector.load %arg7[%c128_60, %c64_61] : memref<624x128xbf16, #tpu.memory_space<vmem>>, vector<16x64xbf16>
    tpu.vector_store %arg7[%c128_60, %c64_61], %98 {strides = array<i32>} : memref<624x128xbf16, #tpu.memory_space<vmem>>, vector<16x64xbf16>,
    %100 = vector.extract_strided_slice %81 {offsets = [0, 9], sizes = [16, 64], strides = [1, 1]} : vector<16x102xbf16> to vector<16x64xbf16>
    %c144_62 = arith.constant 144 : index
    %c64_63 = arith.constant 64 : index
    %101 = vector.load %arg7[%c144_62, %c64_63] : memref<624x128xbf16, #tpu.memory_space<vmem>>, vector<16x64xbf16>
    tpu.vector_store %arg7[%c144_62, %c64_63], %100 {strides = array<i32>} : memref<624x128xbf16, #tpu.memory_space<vmem>>, vector<16x64xbf16>,
    %102 = vector.extract_strided_slice %81 {offsets = [0, 10], sizes = [16, 64], strides = [1, 1]} : vector<16x102xbf16> to vector<16x64xbf16>
    %c160_64 = arith.constant 160 : index
    %c64_65 = arith.constant 64 : index
    %103 = vector.load %arg7[%c160_64, %c64_65] : memref<624x128xbf16, #tpu.memory_space<vmem>>, vector<16x64xbf16>
    tpu.vector_store %arg7[%c160_64, %c64_65], %102 {strides = array<i32>} : memref<624x128xbf16, #tpu.memory_space<vmem>>, vector<16x64xbf16>,
    %104 = vector.extract_strided_slice %81 {offsets = [0, 11], sizes = [16, 64], strides = [1, 1]} : vector<16x102xbf16> to vector<16x64xbf16>
    %c176_66 = arith.constant 176 : index
    %c64_67 = arith.constant 64 : index
    %105 = vector.load %arg7[%c176_66, %c64_67] : memref<624x128xbf16, #tpu.memory_space<vmem>>, vector<16x64xbf16>
    tpu.vector_store %arg7[%c176_66, %c64_67], %104 {strides = array<i32>} : memref<624x128xbf16, #tpu.memory_space<vmem>>, vector<16x64xbf16>,
    %106 = vector.extract_strided_slice %81 {offsets = [0, 12], sizes = [16, 64], strides = [1, 1]} : vector<16x102xbf16> to vector<16x64xbf16>
    %c192_68 = arith.constant 192 : index
    %c64_69 = arith.constant 64 : index
    %107 = vector.load %arg7[%c192_68, %c64_69] : memref<624x128xbf16, #tpu.memory_space<vmem>>, vector<16x64xbf16>
    tpu.vector_store %arg7[%c192_68, %c64_69], %106 {strides = array<i32>} : memref<624x128xbf16, #tpu.memory_space<vmem>>, vector<16x64xbf16>,
    %108 = vector.extract_strided_slice %81 {offsets = [0, 13], sizes = [16, 64], strides = [1, 1]} : vector<16x102xbf16> to vector<16x64xbf16>
    %c208_70 = arith.constant 208 : index
    %c64_71 = arith.constant 64 : index
    %109 = vector.load %arg7[%c208_70, %c64_71] : memref<624x128xbf16, #tpu.memory_space<vmem>>, vector<16x64xbf16>
    tpu.vector_store %arg7[%c208_70, %c64_71], %108 {strides = array<i32>} : memref<624x128xbf16, #tpu.memory_space<vmem>>, vector<16x64xbf16>,
    %110 = vector.extract_strided_slice %81 {offsets = [0, 14], sizes = [16, 64], strides = [1, 1]} : vector<16x102xbf16> to vector<16x64xbf16>
    %c224_72 = arith.constant 224 : index
    %c64_73 = arith.constant 64 : index
    %111 = vector.load %arg7[%c224_72, %c64_73] : memref<624x128xbf16, #tpu.memory_space<vmem>>, vector<16x64xbf16>
    tpu.vector_store %arg7[%c224_72, %c64_73], %110 {strides = array<i32>} : memref<624x128xbf16, #tpu.memory_space<vmem>>, vector<16x64xbf16>,
    %112 = vector.extract_strided_slice %81 {offsets = [0, 15], sizes = [16, 64], strides = [1, 1]} : vector<16x102xbf16> to vector<16x64xbf16>
    %c240_74 = arith.constant 240 : index
    %c64_75 = arith.constant 64 : index
    %113 = vector.load %arg7[%c240_74, %c64_75] : memref<624x128xbf16, #tpu.memory_space<vmem>>, vector<16x64xbf16>
    tpu.vector_store %arg7[%c240_74, %c64_75], %112 {strides = array<i32>} : memref<624x128xbf16, #tpu.memory_space<vmem>>, vector<16x64xbf16>,
    %114 = vector.extract_strided_slice %81 {offsets = [0, 16], sizes = [16, 64], strides = [1, 1]} : vector<16x102xbf16> to vector<16x64xbf16>
    %c256_76 = arith.constant 256 : index
    %c64_77 = arith.constant 64 : index
    %115 = vector.load %arg7[%c256_76, %c64_77] : memref<624x128xbf16, #tpu.memory_space<vmem>>, vector<16x64xbf16>
    tpu.vector_store %arg7[%c256_76, %c64_77], %114 {strides = array<i32>} : memref<624x128xbf16, #tpu.memory_space<vmem>>, vector<16x64xbf16>,
    %116 = vector.extract_strided_slice %81 {offsets = [0, 17], sizes = [16, 64], strides = [1, 1]} : vector<16x102xbf16> to vector<16x64xbf16>
    %c272_78 = arith.constant 272 : index
    %c64_79 = arith.constant 64 : index
    %117 = vector.load %arg7[%c272_78, %c64_79] : memref<624x128xbf16, #tpu.memory_space<vmem>>, vector<16x64xbf16>
    tpu.vector_store %arg7[%c272_78, %c64_79], %116 {strides = array<i32>} : memref<624x128xbf16, #tpu.memory_space<vmem>>, vector<16x64xbf16>,
    %118 = vector.extract_strided_slice %81 {offsets = [0, 18], sizes = [16, 64], strides = [1, 1]} : vector<16x102xbf16> to vector<16x64xbf16>
    %c288_80 = arith.constant 288 : index
    %c64_81 = arith.constant 64 : index
    %119 = vector.load %arg7[%c288_80, %c64_81] : memref<624x128xbf16, #tpu.memory_space<vmem>>, vector<16x64xbf16>
    tpu.vector_store %arg7[%c288_80, %c64_81], %118 {strides = array<i32>} : memref<624x128xbf16, #tpu.memory_space<vmem>>, vector<16x64xbf16>,
    %120 = vector.extract_strided_slice %81 {offsets = [0, 19], sizes = [16, 64], strides = [1, 1]} : vector<16x102xbf16> to vector<16x64xbf16>
    %c304_82 = arith.constant 304 : index
    %c64_83 = arith.constant 64 : index
    %121 = vector.load %arg7[%c304_82, %c64_83] : memref<624x128xbf16, #tpu.memory_space<vmem>>, vector<16x64xbf16>
    tpu.vector_store %arg7[%c304_82, %c64_83], %120 {strides = array<i32>} : memref<624x128xbf16, #tpu.memory_space<vmem>>, vector<16x64xbf16>,
    %122 = vector.extract_strided_slice %81 {offsets = [0, 20], sizes = [16, 64], strides = [1, 1]} : vector<16x102xbf16> to vector<16x64xbf16>
    %c320_84 = arith.constant 320 : index
    %c64_85 = arith.constant 64 : index
    %123 = vector.load %arg7[%c320_84, %c64_85] : memref<624x128xbf16, #tpu.memory_space<vmem>>, vector<16x64xbf16>
    tpu.vector_store %arg7[%c320_84, %c64_85], %122 {strides = array<i32>} : memref<624x128xbf16, #tpu.memory_space<vmem>>, vector<16x64xbf16>,
    %124 = vector.extract_strided_slice %81 {offsets = [0, 21], sizes = [16, 64], strides = [1, 1]} : vector<16x102xbf16> to vector<16x64xbf16>
    %c336_86 = arith.constant 336 : index
    %c64_87 = arith.constant 64 : index
    %125 = vector.load %arg7[%c336_86, %c64_87] : memref<624x128xbf16, #tpu.memory_space<vmem>>, vector<16x64xbf16>
    tpu.vector_store %arg7[%c336_86, %c64_87], %124 {strides = array<i32>} : memref<624x128xbf16, #tpu.memory_space<vmem>>, vector<16x64xbf16>,
    %126 = vector.extract_strided_slice %81 {offsets = [0, 22], sizes = [16, 64], strides = [1, 1]} : vector<16x102xbf16> to vector<16x64xbf16>
    %c352_88 = arith.constant 352 : index
    %c64_89 = arith.constant 64 : index
    %127 = vector.load %arg7[%c352_88, %c64_89] : memref<624x128xbf16, #tpu.memory_space<vmem>>, vector<16x64xbf16>
    tpu.vector_store %arg7[%c352_88, %c64_89], %126 {strides = array<i32>} : memref<624x128xbf16, #tpu.memory_space<vmem>>, vector<16x64xbf16>,
    %128 = vector.extract_strided_slice %81 {offsets = [0, 23], sizes = [16, 64], strides = [1, 1]} : vector<16x102xbf16> to vector<16x64xbf16>
    %c368_90 = arith.constant 368 : index
    %c64_91 = arith.constant 64 : index
    %129 = vector.load %arg7[%c368_90, %c64_91] : memref<624x128xbf16, #tpu.memory_space<vmem>>, vector<16x64xbf16>
    tpu.vector_store %arg7[%c368_90, %c64_91], %128 {strides = array<i32>} : memref<624x128xbf16, #tpu.memory_space<vmem>>, vector<16x64xbf16>,
    %130 = vector.extract_strided_slice %81 {offsets = [0, 24], sizes = [16, 64], strides = [1, 1]} : vector<16x102xbf16> to vector<16x64xbf16>
    %c384_92 = arith.constant 384 : index
    %c64_93 = arith.constant 64 : index
    %131 = vector.load %arg7[%c384_92, %c64_93] : memref<624x128xbf16, #tpu.memory_space<vmem>>, vector<16x64xbf16>
    tpu.vector_store %arg7[%c384_92, %c64_93], %130 {strides = array<i32>} : memref<624x128xbf16, #tpu.memory_space<vmem>>, vector<16x64xbf16>,
    %132 = vector.extract_strided_slice %81 {offsets = [0, 25], sizes = [16, 64], strides = [1, 1]} : vector<16x102xbf16> to vector<16x64xbf16>
    %c400_94 = arith.constant 400 : index
    %c64_95 = arith.constant 64 : index
    %133 = vector.load %arg7[%c400_94, %c64_95] : memref<624x128xbf16, #tpu.memory_space<vmem>>, vector<16x64xbf16>
    tpu.vector_store %arg7[%c400_94, %c64_95], %132 {strides = array<i32>} : memref<624x128xbf16, #tpu.memory_space<vmem>>, vector<16x64xbf16>,
    %134 = vector.extract_strided_slice %81 {offsets = [0, 26], sizes = [16, 64], strides = [1, 1]} : vector<16x102xbf16> to vector<16x64xbf16>
    %c416_96 = arith.constant 416 : index
    %c64_97 = arith.constant 64 : index
    %135 = vector.load %arg7[%c416_96, %c64_97] : memref<624x128xbf16, #tpu.memory_space<vmem>>, vector<16x64xbf16>
    tpu.vector_store %arg7[%c416_96, %c64_97], %134 {strides = array<i32>} : memref<624x128xbf16, #tpu.memory_space<vmem>>, vector<16x64xbf16>,
    %136 = vector.extract_strided_slice %81 {offsets = [0, 27], sizes = [16, 64], strides = [1, 1]} : vector<16x102xbf16> to vector<16x64xbf16>
    %c432_98 = arith.constant 432 : index
    %c64_99 = arith.constant 64 : index
    %137 = vector.load %arg7[%c432_98, %c64_99] : memref<624x128xbf16, #tpu.memory_space<vmem>>, vector<16x64xbf16>
    tpu.vector_store %arg7[%c432_98, %c64_99], %136 {strides = array<i32>} : memref<624x128xbf16, #tpu.memory_space<vmem>>, vector<16x64xbf16>,
    %138 = vector.extract_strided_slice %81 {offsets = [0, 28], sizes = [16, 64], strides = [1, 1]} : vector<16x102xbf16> to vector<16x64xbf16>
    %c448_100 = arith.constant 448 : index
    %c64_101 = arith.constant 64 : index
    %139 = vector.load %arg7[%c448_100, %c64_101] : memref<624x128xbf16, #tpu.memory_space<vmem>>, vector<16x64xbf16>
    tpu.vector_store %arg7[%c448_100, %c64_101], %138 {strides = array<i32>} : memref<624x128xbf16, #tpu.memory_space<vmem>>, vector<16x64xbf16>,
    %140 = vector.extract_strided_slice %81 {offsets = [0, 29], sizes = [16, 64], strides = [1, 1]} : vector<16x102xbf16> to vector<16x64xbf16>
    %c464_102 = arith.constant 464 : index
    %c64_103 = arith.constant 64 : index
    %141 = vector.load %arg7[%c464_102, %c64_103] : memref<624x128xbf16, #tpu.memory_space<vmem>>, vector<16x64xbf16>
    tpu.vector_store %arg7[%c464_102, %c64_103], %140 {strides = array<i32>} : memref<624x128xbf16, #tpu.memory_space<vmem>>, vector<16x64xbf16>,
    %142 = vector.extract_strided_slice %81 {offsets = [0, 30], sizes = [16, 64], strides = [1, 1]} : vector<16x102xbf16> to vector<16x64xbf16>
    %c480_104 = arith.constant 480 : index
    %c64_105 = arith.constant 64 : index
    %143 = vector.load %arg7[%c480_104, %c64_105] : memref<624x128xbf16, #tpu.memory_space<vmem>>, vector<16x64xbf16>
    tpu.vector_store %arg7[%c480_104, %c64_105], %142 {strides = array<i32>} : memref<624x128xbf16, #tpu.memory_space<vmem>>, vector<16x64xbf16>,
    %144 = vector.extract_strided_slice %81 {offsets = [0, 31], sizes = [16, 64], strides = [1, 1]} : vector<16x102xbf16> to vector<16x64xbf16>
    %c496_106 = arith.constant 496 : index
    %c64_107 = arith.constant 64 : index
    %145 = vector.load %arg7[%c496_106, %c64_107] : memref<624x128xbf16, #tpu.memory_space<vmem>>, vector<16x64xbf16>
    tpu.vector_store %arg7[%c496_106, %c64_107], %144 {strides = array<i32>} : memref<624x128xbf16, #tpu.memory_space<vmem>>, vector<16x64xbf16>,
    %146 = vector.extract_strided_slice %81 {offsets = [0, 32], sizes = [16, 64], strides = [1, 1]} : vector<16x102xbf16> to vector<16x64xbf16>
    %c512_108 = arith.constant 512 : index
    %c64_109 = arith.constant 64 : index
    %147 = vector.load %arg7[%c512_108, %c64_109] : memref<624x128xbf16, #tpu.memory_space<vmem>>, vector<16x64xbf16>
    tpu.vector_store %arg7[%c512_108, %c64_109], %146 {strides = array<i32>} : memref<624x128xbf16, #tpu.memory_space<vmem>>, vector<16x64xbf16>,
    %148 = vector.extract_strided_slice %81 {offsets = [0, 33], sizes = [16, 64], strides = [1, 1]} : vector<16x102xbf16> to vector<16x64xbf16>
    %c528_110 = arith.constant 528 : index
    %c64_111 = arith.constant 64 : index
    %149 = vector.load %arg7[%c528_110, %c64_111] : memref<624x128xbf16, #tpu.memory_space<vmem>>, vector<16x64xbf16>
    tpu.vector_store %arg7[%c528_110, %c64_111], %148 {strides = array<i32>} : memref<624x128xbf16, #tpu.memory_space<vmem>>, vector<16x64xbf16>,
    %150 = vector.extract_strided_slice %81 {offsets = [0, 34], sizes = [16, 64], strides = [1, 1]} : vector<16x102xbf16> to vector<16x64xbf16>
    %c544_112 = arith.constant 544 : index
    %c64_113 = arith.constant 64 : index
    %151 = vector.load %arg7[%c544_112, %c64_113] : memref<624x128xbf16, #tpu.memory_space<vmem>>, vector<16x64xbf16>
    tpu.vector_store %arg7[%c544_112, %c64_113], %150 {strides = array<i32>} : memref<624x128xbf16, #tpu.memory_space<vmem>>, vector<16x64xbf16>,
    %152 = vector.extract_strided_slice %81 {offsets = [0, 35], sizes = [16, 64], strides = [1, 1]} : vector<16x102xbf16> to vector<16x64xbf16>
    %c560_114 = arith.constant 560 : index
    %c64_115 = arith.constant 64 : index
    %153 = vector.load %arg7[%c560_114, %c64_115] : memref<624x128xbf16, #tpu.memory_space<vmem>>, vector<16x64xbf16>
    tpu.vector_store %arg7[%c560_114, %c64_115], %152 {strides = array<i32>} : memref<624x128xbf16, #tpu.memory_space<vmem>>, vector<16x64xbf16>,
    %154 = vector.extract_strided_slice %81 {offsets = [0, 36], sizes = [16, 64], strides = [1, 1]} : vector<16x102xbf16> to vector<16x64xbf16>
    %c576_116 = arith.constant 576 : index
    %c64_117 = arith.constant 64 : index
    %155 = vector.load %arg7[%c576_116, %c64_117] : memref<624x128xbf16, #tpu.memory_space<vmem>>, vector<16x64xbf16>
    tpu.vector_store %arg7[%c576_116, %c64_117], %154 {strides = array<i32>} : memref<624x128xbf16, #tpu.memory_space<vmem>>, vector<16x64xbf16>,
    %156 = vector.extract_strided_slice %81 {offsets = [0, 37], sizes = [16, 64], strides = [1, 1]} : vector<16x102xbf16> to vector<16x64xbf16>
    %c592_118 = arith.constant 592 : index
    %c64_119 = arith.constant 64 : index
    %157 = vector.load %arg7[%c592_118, %c64_119] : memref<624x128xbf16, #tpu.memory_space<vmem>>, vector<16x64xbf16>
    tpu.vector_store %arg7[%c592_118, %c64_119], %156 {strides = array<i32>} : memref<624x128xbf16, #tpu.memory_space<vmem>>, vector<16x64xbf16>,
    %158 = vector.extract_strided_slice %81 {offsets = [0, 38], sizes = [16, 64], strides = [1, 1]} : vector<16x102xbf16> to vector<16x64xbf16>
    %c608_120 = arith.constant 608 : index
    %c64_121 = arith.constant 64 : index
    %159 = vector.load %arg7[%c608_120, %c64_121] : memref<624x128xbf16, #tpu.memory_space<vmem>>, vector<16x64xbf16>
    tpu.vector_store %arg7[%c608_120, %c64_121], %158 {strides = array<i32>} : memref<624x128xbf16, #tpu.memory_space<vmem>>, vector<16x64xbf16>,
    %c0_122 = arith.constant 0 : index
    %c0_123 = arith.constant 0 : index
    %160 = vector.load %arg3[%c0_122, %c0_123] : memref<16x624xbf16, #tpu.memory_space<vmem>>, vector<16x624xbf16>
    %c0_124 = arith.constant 0 : index
    %c0_125 = arith.constant 0 : index
    %161 = vector.load %arg7[%c0_124, %c0_125] : memref<624x128xbf16, #tpu.memory_space<vmem>>, vector<624x128xbf16>
    %cst = arith.constant dense<0.000000e+00> : vector<16x128xf32>
    %162 = tpu.matmul %160, %161, %cst {dimension_numbers = #tpu.dot_dimension_numbers<[1], [0], [0], [1], [0, 0, 1, 1], [], []>} : vector<16x624xbf16>, vector<624x128xbf16>, vector<16x128xf32> -> vector<16x128xf32>
    %163 = vector.extract_strided_slice %162 {offsets = [0, 0], sizes = [8, 128], strides = [1, 1]} : vector<16x128xf32> to vector<8x128xf32>
    %164 = vector.extract_strided_slice %162 {offsets = [8, 0], sizes = [8, 128], strides = [1, 1]} : vector<16x128xf32> to vector<8x128xf32>
    %c0_126 = arith.constant 0 : index
    %c0_127 = arith.constant 0 : index
    %c0_128 = arith.constant 0 : index
    %165 = vector.load %arg2[%c0_126, %c0_127, %c0_128] : memref<1x8x128xi8, #tpu.memory_space<vmem>>, vector<1x8x128xi8>
    %166 = vector.shape_cast %165 : vector<1x8x128xi8> to vector<8x128xi8>
    %167 = arith.extsi %166 : vector<8x128xi8> to vector<8x128xi32>
    %c1_i32 = arith.constant 1 : i32
    %168 = tpu.dynamic_rotate %167 by %c1_i32 dim 1 : vector<8x128xi32>, i32 -> vector<8x128xi32>
    %c1_i32_129 = arith.constant 1 : i32
    %169 = tpu.dynamic_rotate %164 by %c1_i32_129 dim 1 : vector<8x128xf32>, i32 -> vector<8x128xf32>
    %c127_i32 = arith.constant 127 : i32
    %170 = tpu.dynamic_rotate %167 by %c127_i32 dim 1 : vector<8x128xi32>, i32 -> vector<8x128xi32>
    %c127_i32_130 = arith.constant 127 : i32
    %171 = tpu.dynamic_rotate %164 by %c127_i32_130 dim 1 : vector<8x128xf32>, i32 -> vector<8x128xf32>
    %c2_i32 = arith.constant 2 : i32
    %172 = vector.broadcast %c2_i32 : i32 to vector<8x128xi32>
    %173 = arith.cmpi eq, %168, %172 : vector<8x128xi32>
    %cst_131 = arith.constant 0.000000e+00 : f32
    %174 = vector.broadcast %cst_131 : f32 to vector<8x128xf32>
    %175 = arith.select %173, %169, %174 : vector<8x128xi1>, vector<8x128xf32>
    %c1_i32_132 = arith.constant 1 : i32
    %176 = vector.broadcast %c1_i32_132 : i32 to vector<8x128xi32>
    %177 = arith.cmpi eq, %167, %176 : vector<8x128xi32>
    %178 = arith.select %177, %164, %175 : vector<8x128xi1>, vector<8x128xf32>
    %c0_i32 = arith.constant 0 : i32
    %179 = vector.broadcast %c0_i32 : i32 to vector<8x128xi32>
    %180 = arith.cmpi eq, %170, %179 : vector<8x128xi32>
    %181 = arith.select %180, %171, %178 : vector<8x128xi1>, vector<8x128xf32>
    %182 = arith.addf %163, %181 : vector<8x128xf32>
    %183 = arith.truncf %182 : vector<8x128xf32> to vector<8x128xbf16>
    %c0_133 = arith.constant 0 : index
    %c0_134 = arith.constant 0 : index
    %c0_135 = arith.constant 0 : index
    %184 = vector.load %arg4[%c0_133, %c0_134, %c0_135] : memref<1x8x128xbf16, #tpu.memory_space<vmem>>, vector<1x8x128xbf16>
    %185 = vector.shape_cast %184 : vector<1x8x128xbf16> to vector<8x128xbf16>
    %186 = vector.shape_cast %183 : vector<8x128xbf16> to vector<1x8x128xbf16>
    tpu.vector_store %arg4[%c0_133, %c0_134, %c0_135], %186 {strides = array<i32>} : memref<1x8x128xbf16, #tpu.memory_space<vmem>>, vector<1x8x128xbf16>,
    %cst_136 = arith.constant dense<0.000000e+00> : vector<8xf32>
    %187 = vector.multi_reduction <add>, %182, %cst_136 [1] : vector<8x128xf32> to vector<8xf32>
    %188 = vector.shape_cast %187 : vector<8xf32> to vector<8x1xf32>
    %c0_137 = arith.constant 0 : index
    %c0_138 = arith.constant 0 : index
    %c0_139 = arith.constant 0 : index
    %189 = vector.load %arg5[%c0_137, %c0_138, %c0_139] : memref<1x8x1xf32, #tpu.memory_space<vmem>>, vector<1x8x1xf32>
    %190 = vector.shape_cast %189 : vector<1x8x1xf32> to vector<8x1xf32>
    %191 = vector.shape_cast %188 : vector<8x1xf32> to vector<1x8x1xf32>
    tpu.vector_store %arg5[%c0_137, %c0_138, %c0_139], %191 {strides = array<i32>} : memref<1x8x1xf32, #tpu.memory_space<vmem>>, vector<1x8x1xf32>,
    %192 = arith.mulf %182, %182 : vector<8x128xf32>
    %cst_140 = arith.constant dense<0.000000e+00> : vector<8xf32>
    %193 = vector.multi_reduction <add>, %192, %cst_140 [1] : vector<8x128xf32> to vector<8xf32>
    %194 = vector.shape_cast %193 : vector<8xf32> to vector<8x1xf32>
    %c0_141 = arith.constant 0 : index
    %c0_142 = arith.constant 0 : index
    %c0_143 = arith.constant 0 : index
    %195 = vector.load %arg6[%c0_141, %c0_142, %c0_143] : memref<1x8x1xf32, #tpu.memory_space<vmem>>, vector<1x8x1xf32>
    %196 = vector.shape_cast %195 : vector<1x8x1xf32> to vector<8x1xf32>
    %197 = vector.shape_cast %194 : vector<8x1xf32> to vector<1x8x1xf32>
    tpu.vector_store %arg6[%c0_141, %c0_142, %c0_143], %197 {strides = array<i32>} : memref<1x8x1xf32, #tpu.memory_space<vmem>>, vector<1x8x1xf32>,
    return
  }
  func.func @transform_0(%arg0: i32) -> (i32, i32, i32) {
    %c0_i32 = arith.constant 0 : i32
    %c0_i32_0 = arith.constant 0 : i32
    %c0_i32_1 = arith.constant 0 : i32
    return %arg0, %c0_i32, %c0_i32_0 : i32, i32, i32
  }
  func.func @transform_1(%arg0: i32) -> (i32, i32, i32) {
    %c0_i32 = arith.constant 0 : i32
    %c0_i32_0 = arith.constant 0 : i32
    %c0_i32_1 = arith.constant 0 : i32
    return %arg0, %c0_i32, %c0_i32_0 : i32, i32, i32
  }
  func.func @transform_2(%arg0: i32) -> (i32, i32) {
    %c0_i32 = arith.constant 0 : i32
    %c0_i32_0 = arith.constant 0 : i32
    %c0_i32_1 = arith.constant 0 : i32
    return %c0_i32, %c0_i32_0 : i32, i32
  }
  func.func @transform_3(%arg0: i32) -> (i32, i32, i32) {
    %c0_i32 = arith.constant 0 : i32
    %c0_i32_0 = arith.constant 0 : i32
    %c0_i32_1 = arith.constant 0 : i32
    return %arg0, %c0_i32, %c0_i32_0 : i32, i32, i32
  }
  func.func @transform_4(%arg0: i32) -> (i32, i32, i32) {
    %c0_i32 = arith.constant 0 : i32
    %c0_i32_0 = arith.constant 0 : i32
    %c0_i32_1 = arith.constant 0 : i32
    return %arg0, %c0_i32, %c0_i32_0 : i32, i32, i32
  }
  func.func @transform_5(%arg0: i32) -> (i32, i32, i32) {
    %c0_i32 = arith.constant 0 : i32
    %c0_i32_0 = arith.constant 0 : i32
    %c0_i32_1 = arith.constant 0 : i32
    return %arg0, %c0_i32, %c0_i32_0 : i32, i32, i32
  }
}

</mosaic_0001>

<bundles_post_ra>
// kernel: tpu_custom_call.1
= control target key start
LH: loop header
LB: loop body
LE: loop exit
PB: predicated region body
PF: predicated region fallthrough
CT: control target
= control target key end

     0   :  { %s1999_s0 = inlined_call_operand.hbm [shape: bf16[4,16,102], index: 0, kind: input, shape index: {}]   ;;  %s2000_s1 = inlined_call_operand.hbm [shape: s8[2,8,128], index: 1, kind: input, shape index: {}]   ;;  %s2001_s2 = inlined_call_operand.hbm [shape: bf16[16,624], index: 2, kind: input, shape index: {}]   ;;  %s2002_s3 = inlined_call_operand.hbm [shape: bf16[2,8,128], index: 3, kind: output, shape index: {0}]   ;;  %s2003_s4 = inlined_call_operand.vmem [shape: f32[2,8,1], index: 4, kind: output, shape index: {1}]   ;;  %s2004_s5 = inlined_call_operand.vmem [shape: f32[2,8,1], index: 5, kind: output, shape index: {2}]  }
   0x1   :  { %2009 = sst [smem:[#allocation15_spill]] %s1999_s0 }
   0x2   :  { %2010 = sst [smem:[#allocation16_spill]] %s2001_s2 }
   0x3   :  { %11 = vsyncpa [#allocation4], 0 }
   0x4   :  { %13 = vsyncpa [#allocation4 + $0x1], 0 }
   0x5   :  { %14 = vsyncpa [#allocation7], 0 }
   0x6   :  { %16 = vsyncpa [#allocation7 + $0x1], 0 }
   0x7   :  { %17 = vsyncpa [#allocation5], 0 }
   0x8   :  { %19 = vsyncpa [#allocation5 + $0x1], 0  ;;  %s1587_s18 = smov 0   ;;  %s1589_s19 = smov 0  }
   0x9   :  { %s1591_s20 = smov 0   ;;  %s1593_s21 = smov 0  }
   0xa LB: > { %s1608_s22 = sadd.s32 4294967295, %s1467_s21   ;;  %s1047_s23 = sadd.s32 4294967294, %s1467_s21   ;;  %s1467_s21 = sphi %s1593_s21, %s2032_s21   ;;  %s1463_s20 = sphi %s1591_s20, %s2031_s20   ;;  %s1459_s19 = sphi %s1589_s19, %s2030_s19   ;;  %s1455_s18 = sphi %s1587_s18, %s2029_s18  }
   0xb   : > { %p45_p0 = scmp.ne.s32.totalorder %s1459_s19, %s1455_s18  ;;  %p2005_p1 = scmp.eq.s32.totalorder %s1608_s22, 0 }
   0xc   : > { %p122_p3 = scmp.eq.s32.totalorder %s1047_s23, 1  ;;  %p1048_p5 = scmp.ge.s32.totalorder %s1467_s21, 1 }
   0xd   : > { %p1617_p4 = por %p2005_p1, %p45_p0  ;;  %p181_p7 = scmp.lt.s32.totalorder %s1467_s21, 3 }
   0xe   : > { %p1622_p6 = por %p122_p3, %p45_p0  ;;  %s1469_s27 = smov [#allocation8]  }
   0xf   : > { %s2011_s24 = scalar_select %p1617_p4, 1, 0 }
  0x10   : > { %s2012_s25 = scalar_select %p1622_p6, 1, 0 }
  0x11   : > { %p1627_p8 = pnand %p1048_p5, %p181_p7  ;;  %s193_s28 = sshll.u32 %s1469_s27, 4  ;;  %s1631_s28 = int_to_ptr.vmem [resolvable:$true] %s193_s28 }
  0x12   : > { %s1643_s30 = sadd.s32 1, %s1467_s21   ;;  %s32_s6 = sadd.s32 1, %s1463_s20 }
  0x13   : > { %s2013_s26 = scalar_select %p1627_p8, 1, 0 }
  0x14   : > { %p1160_p9 = pneg %p1627_p8  ;;  %s29_s7 = ssub.s32 %s1467_s21, %s1643_s30 }
  0x15   : > { %s2015_s2 = sld [smem:[#allocation16_spill]] }
  0x16   : > { %p1638_p11 = pnand %p1160_p9, %p2005_p1 }
  0x18   : > { %p1307_p13 = pneg %p1638_p11 }
  0x1b   : > { %s1305_s10 = scalar_lea.hbm %s2015_s2, 640 }
  0x1c   : > { %p1306_p12 = scmp.ne.s32.totalorder %s2015_s2, %s1305_s10  ;;  %p1312_p5 = scmp.lt.u32.totalorder %s1305_s10, %s2015_s2 }
  0x1e   : > { %p1308_p0 = pnand %p1307_p13, %p1306_p12 }
  0x20   : > { %p1309_p3 = pneg %p1308_p0 }
  0x22   : > { %p1314_p7 = pnand %p1312_p5, %p1309_p3 }
  0x24   : > { %1317 = shalt.err (!%p1314_p7)
}
  0x25   : > { %s1318_s15 = scalar_lea.vmem %s1631_s28, 640  ;;  %p1326_p2 = scmp.lt.s32.totalorder %s1631_s28, %s1631_s28 }
  0x26   : > { %p1319_p9 = scmp.ne.s32.totalorder %s1631_s28, %s1318_s15  ;;  %p1327_p6 = scmp.lt.s32.totalorder %s1318_s15, %s1318_s15 }
  0x28   : > { %p1321_p10 = pnand %p1319_p9, %p1307_p13  ;;  %p1328_p4 = por %p1327_p6, %p1326_p2 }
  0x2a   : > { %p1322_p1 = pneg %p1321_p10 }
  0x2c   : > { %p1329_p8 = pnand %p1328_p4, %p1322_p1 }
  0x2e   : > { %1332 = shalt.err (!%p1329_p8)
}
  0x2f   : > { %s1470_s16 = smov 320   ;;  %s1471_s17 = smov 20  }
  0x30   : > { %1163 = dma.hbm_to_vmem [thread:$0]  (!%p1638_p11), %s2015_s2, 640, %s1631_s28, [#allocation7], %s1470_s16, %s1470_s16, %s1471_s17  }
  0x31   : > { %p30_p2 = scmp.eq.s32.totalorder %s29_s7, 0  ;;  %p39_p1 = scmp.ne.s32.totalorder %s1463_s20, %s1459_s19 }
  0x32   : > { %p40_p4 = scmp.eq.s32.totalorder %s1467_s21, 0  ;;  %p1176_p6 = scmp.lt.s32.totalorder %s1467_s21, 2 }
  0x33   : > { %s1674_s8 = scalar_select %p30_p2, %s1463_s20, %s32_s6  }
  0x34   : > { %p41_p8 = por %p40_p4, %p39_p1  ;;  %p2017_p10 = scmp.eq.s32.totalorder %s1608_s22, 1 }
  0x35   : > { %2016 = sst [smem:[#allocation14_spill]] %s1674_s8  ;;  %s1683_s10 = sand.u32 1, %s1463_s20  }
  0x36   : > { %p1678_p12 = por %p2017_p10, %p39_p1  ;;  %s1079_s29 = sshll.u32 %s1467_s21, 8 }
  0x37   : > { %s1051_s11 = sshll.u32 %s1683_s10, 4  ;;  %s2019_s0 = sld [smem:[#allocation15_spill]] }
  0x38   : > { %s2018_s9 = scalar_select %p1678_p12, 1, 0 }
  0x39   : > { %s211_s6 = scalar_lea.vmem [#allocation3], %s1051_s11  ;;  %p1692_p11 = pnand %p1176_p6, %p41_p8 }
  0x3a   : > { %s219_s13 = sshll.u32 %s211_s6, 4  ;;  %s208_s15 = scalar_lea.sflag [#allocation4], %s1683_s10  ;;  %s1696_s13 = int_to_ptr.vmem [resolvable:$true] %s219_s13 }
  0x3b   : > { %p1335_p0 = pneg %p1692_p11 }
  0x3d   : > { %s1690_s7 = scalar_lea.hbm %s2019_s0, %s1079_s29  ;;  %s1338_s27 = scalar_lea.hbm %s2019_s0, 512 }
  0x3e   : > { %s1333_s16 = scalar_lea.hbm %s1690_s7, 256  ;;  %p1339_p7 = scmp.lt.u32.totalorder %s1690_s7, %s2019_s0 }
  0x3f   : > { %p1334_p13 = scmp.ne.s32.totalorder %s1690_s7, %s1333_s16  ;;  %p1340_p9 = scmp.lt.u32.totalorder %s1338_s27, %s1333_s16 }
  0x40   : > { %p1342_p1 = scmp.lt.u32.totalorder %s1333_s16, %s1690_s7 }
  0x41   : > { %p1336_p3 = pnand %p1335_p0, %p1334_p13  ;;  %p1341_p2 = por %p1340_p9, %p1339_p7 }
  0x43   : > { %p1337_p5 = pneg %p1336_p3  ;;  %p1343_p4 = por %p1342_p1, %p1341_p2 }
  0x45   : > { %p1344_p6 = pnand %p1343_p4, %p1337_p5 }
  0x47   : > { %1347 = shalt.err (!%p1344_p6)
}
  0x48   : > { %s1348_s12 = scalar_lea.vmem %s1696_s13, 256  ;;  %s1472_s28 = smov [#allocation3]  }
  0x49   : > { %p1349_p8 = scmp.ne.s32.totalorder %s1696_s13, %s1348_s12  ;;  %s1353_s6 = sshll.u32 %s1472_s28, 4  ;;  %s1354_s6 = int_to_ptr.vmem [resolvable:$false] %s1353_s6 }
  0x4a   : > { %s1355_s17 = scalar_lea.vmem %s1354_s6, 512  ;;  %p1356_p3 = scmp.lt.s32.totalorder %s1696_s13, %s1354_s6 }
  0x4b   : > { %p1351_p10 = pnand %p1349_p8, %p1335_p0  ;;  %p1357_p7 = scmp.lt.s32.totalorder %s1355_s17, %s1348_s12 }
  0x4d   : > { %p1352_p13 = pneg %p1351_p10  ;;  %p1358_p9 = por %p1357_p7, %p1356_p3 }
  0x4f   : > { %p1359_p2 = pnand %p1358_p9, %p1352_p13 }
  0x51   : > { %1362 = shalt.err (!%p1359_p2)
}
  0x52   : > { %s1473_s16 = smov 64   ;;  %s1474_s23 = smov 4  }
  0x53   : > { %1167 = dma.hbm_to_vmem [thread:$0]  (!%p1692_p11), %s1690_s7, 256, %s1696_s13, %s208_s15, %s1473_s16, %s1473_s16, %s1474_s23  }
  0x54   : > { %s229_s27 = sand.u32 1, %s1467_s21   ;;  %s1055_s29 = sshll.u32 %s1683_s10, 1 }
  0x55   : > { %s1056_s11 = sshll.u32 %s1467_s21, 5  ;;  %s233_s12 = scalar_lea.vmem [#allocation6], %s1055_s29 }
  0x56   : > { %s240_s28 = sshll.u32 %s233_s12, 4  ;;  %s1732_s0 = scalar_lea.hbm %s2000_s1, %s1056_s11  ;;  %s241_s28 = int_to_ptr.vmem [resolvable:$true] %s240_s28 }
  0x57   : > { %s230_s2 = scalar_lea.sflag [#allocation7], %s229_s27  ;;  %s1363_s8 = scalar_lea.hbm %s1732_s0, 32 }
  0x58   : > { %p1364_p5 = scmp.ne.s32.totalorder %s1732_s0, %s1363_s8  ;;  %s1368_s13 = scalar_lea.hbm %s2000_s1, 64 }
  0x59   : > { %p1369_p6 = scmp.lt.u32.totalorder %s1732_s0, %s2000_s1  ;;  %p1370_p8 = scmp.lt.u32.totalorder %s1368_s13, %s1363_s8 }
  0x5a   : > { %p1366_p1 = pnand %p1364_p5, %p1335_p0  ;;  %p1372_p13 = scmp.lt.u32.totalorder %s1363_s8, %s1732_s0 }
  0x5b   : > { %p1371_p10 = por %p1370_p8, %p1369_p6 }
  0x5c   : > { %p1367_p4 = pneg %p1366_p1 }
  0x5d   : > { %p1373_p3 = por %p1372_p13, %p1371_p10 }
  0x5f   : > { %p1374_p7 = pnand %p1373_p3, %p1367_p4 }
  0x61   : > { %1377 = shalt.err (!%p1374_p7)
}
  0x62   : > { %s1378_s23 = scalar_lea.vmem %s241_s28, 32  ;;  %s1475_s27 = smov [#allocation6]  }
  0x63   : > { %p1379_p9 = scmp.ne.s32.totalorder %s241_s28, %s1378_s23  ;;  %s1383_s29 = sshll.u32 %s1475_s27, 4  ;;  %s1384_s29 = int_to_ptr.vmem [resolvable:$false] %s1383_s29 }
  0x64   : > { %s1385_s11 = scalar_lea.vmem %s1384_s29, 64  ;;  %p1386_p1 = scmp.lt.s32.totalorder %s241_s28, %s1384_s29 }
  0x65   : > { %p1381_p2 = pnand %p1379_p9, %p1335_p0  ;;  %p1387_p12 = scmp.lt.s32.totalorder %s1385_s11, %s1378_s23 }
  0x67   : > { %p1382_p5 = pneg %p1381_p2  ;;  %p1388_p6 = por %p1387_p12, %p1386_p1 }
  0x69   : > { %p1389_p8 = pnand %p1388_p6, %p1382_p5 }
  0x6b   : > { %1392 = shalt.err (!%p1389_p8)
}
  0x6c   : > { %1170 = dma.hbm_to_vmem [thread:$0]  (!%p1692_p11), %s1732_s0, 32, %s241_s28, %s230_s2  }
  0x6d   : > { %p2021_p4 = scmp.ne.s32.totalorder %s2013_s26, 0 }
  0x6e   : > { %s1756_s8 = sand.u32 (!%p2021_p4), 1, %s1459_s19   ;;  %p2022_p0 = scmp.ne.s32.totalorder (!%p2021_p4), %s2011_s24, 0 }
  0x6f   : > { %249 = sbr.rel (%p2021_p4) target bundleno = 888 (0x378), region = 32  ;;  %s1058_s12 = sshll.u32 (!%p2021_p4), %s1756_s8, 4 }
  0x70   : > { %s252_s6 = scalar_lea.sflag (!%p2021_p4), [#allocation4], %s1756_s8  ;;  %s255_s17 = scalar_lea.vmem (!%p2021_p4), [#allocation3], %s1058_s12 }
  0x76   : > { %1438 = dma.done.wait (%p2022_p0), %s252_s6, 256  }
  0x77   : > { %1440 = vsyncadd (%p2022_p0), %s252_s6, 4294967040  ;;  %s260_s0 = sand.u32 1, %s1608_s22   ;;  %s1059_s2 = sshll.u32 %s1756_s8, 1 }
  0x78   : > { %s261_s26 = scalar_lea.sflag [#allocation7], %s260_s0  ;;  %s1766_s14 = scalar_lea.vmem [#allocation6], %s1059_s2 }
  0x79   : > { %1442 = dma.done.wait (%p2022_p0), %s261_s26, 32  }
  0x7a   : > { %1444 = vsyncadd (%p2022_p0), %s261_s26, 4294967264  ;;  %p2023_p12 = scmp.eq.s32.totalorder %s1608_s22, 0 }
  0x7c   : > { %1446 = dma.done.wait (%p2023_p12), [#allocation7], 640   ;;  %p2024_p11 = pmov %p2023_p12 }
  0x7d   : > { %v1776_v0 = vld [vmem:[%s255_s17 + $0x8] sm:$0xff]   ;;  %v1778_v1 = vld [vmem:[%s255_s17] sm:$0xff]   ;;  %s1476_s28 = smov 64   ;;  %vm326_vm0 = vcmask 523264   ;;  %s1477_s10 = smov 120   ;;  %vm491_vm1 = vcmask 1048064  }
  0x7e   : > { %1448 = vsyncadd (%p2024_p11), [#allocation7], 4294966656  ;;  %488 = vrot.lane.b32.xlu1 %v1776_v0, %s1476_s28  ;;  %356 = vrot.lane.b32.xlu0 %v1778_v1, %s1477_s10  ;;  %327 = vst.msk [vmem:[#allocation2] sm:$0xff] %vm326_vm0, %v1778_v1  ;;  %s1478_s24 = smov 119   ;;  %s1479_s7 = smov 56   ;;  %vm1554_vm2 = vmmov 0  }
  0x7f   : > { %s1480_s13 = smov 55   ;;  %s1481_s15 = smov 127   ;;  %v1300_v2 = vld [vmem:[#allocation8 + $0x4] ss:$20 sps:$4 sm:$0xff]   ;;  %v1303_v22 = vld [vmem:[#allocation8 + $0xc] ss:$20 sps:$4 sm:$0xff]  }
  0x80   : > { %s1482_s16 = smov 118   ;;  %s1483_s23 = smov 63   ;;  %751 = vmatprep.mubr.bf16.mxu0 %v1300_v2  ;;  %792 = vmatprep.mubr.bf16.mxu1 %v1303_v22  ;;  %vm715_vm3 = vcmask 916480  }
  0x81   : > { %s1484_s27 = smov 54   ;;  %s1485_s29 = smov 126  }
  0x82   : > { %360 = vrot.lane.b32.xlu1 %v1778_v1, %s1478_s24  ;;  %521 = vrot.lane.b32.xlu0 %v1776_v0, %s1479_s7  ;;  %s1486_s11 = smov 117   ;;  %s1487_s12 = smov 62  }
  0x83   : > { %s1488_s6 = smov 53   ;;  %s1489_s17 = smov 125  }
  0x84   : > { %s1490_s0 = smov 116   ;;  %s1491_s2 = smov 61  }
  0x85   : > { %s1492_s26 = smov 52   ;;  %s1493_s28 = smov 124  }
  0x86   : > { %525 = vrot.lane.b32.xlu1 %v1776_v0, %s1480_s13  ;;  %328 = vrot.lane.b32.xlu0 %v1778_v1, %s1481_s15  ;;  %s1494_s10 = smov 115   ;;  %s1495_s24 = smov 60  }
  0x87   : > { %s1496_s7 = smov 51   ;;  %s1497_s13 = smov 123  }
  0x88   : > { %p2025_p13 = scmp.ne.s32.totalorder %s2018_s9, 0 }
  0x8a   : > { %364 = vrot.lane.b32.xlu1 %v1778_v1, %s1482_s16  ;;  %493 = vrot.lane.b32.xlu0 %v1776_v0, %s1483_s23  ;;  %s1498_s16 = smov 104   ;;  %s1499_s23 = smov 59  }
  0x8e   : > { %529 = vrot.lane.b32.xlu1 %v1776_v0, %s1484_s27  ;;  %332 = vrot.lane.b32.xlu0 %v1778_v1, %s1485_s29  ;;  %s1500_s27 = smov 112   ;;  %s1501_s29 = smov 114  }
  0x92   : > { %368 = vrot.lane.b32.xlu1 %v1778_v1, %s1486_s11  ;;  %497 = vrot.lane.b32.xlu0 %v1776_v0, %s1487_s12  ;;  %s1502_s11 = smov 122   ;;  %s1503_s12 = smov 40  }
  0x96   : > { %533 = vrot.lane.b32.xlu1 %v1776_v0, %s1488_s6  ;;  %336 = vrot.lane.b32.xlu0 %v1778_v1, %s1489_s17  ;;  %s1504_s6 = smov 48   ;;  %s1505_s17 = smov 50  }
  0x9a   : > { %372 = vrot.lane.b32.xlu1 %v1778_v1, %s1490_s0  ;;  %501 = vrot.lane.b32.xlu0 %v1776_v0, %s1491_s2  ;;  %s1506_s0 = smov 103   ;;  %s1507_s2 = smov 58  }
  0x9e   : > { %537 = vrot.lane.b32.xlu1 %v1776_v0, %s1492_s26  ;;  %340 = vrot.lane.b32.xlu0 %v1778_v1, %s1493_s28  ;;  %s1508_s26 = smov 111   ;;  %s1509_s28 = smov 113  }
  0xa2   : > { %376 = vrot.lane.b32.xlu1 %v1778_v1, %s1494_s10  ;;  %505 = vrot.lane.b32.xlu0 %v1776_v0, %s1495_s24  ;;  %s1510_s10 = smov 121   ;;  %s1511_s24 = smov 39  }
  0xa6   : > { %541 = vrot.lane.b32.xlu1 %v1776_v0, %s1496_s7  ;;  %344 = vrot.lane.b32.xlu0 %v1778_v1, %s1497_s13  ;;  %s1512_s7 = smov 47   ;;  %s1513_s13 = smov 49  }
  0xaa   : > { %420 = vrot.lane.b32.xlu1 %v1778_v1, %s1498_s16  ;;  %509 = vrot.lane.b32.xlu0 %v1776_v0, %s1499_s23  ;;  %s1514_s16 = smov 102   ;;  %s1515_s23 = smov 57  }
  0xae   : > { %388 = vrot.lane.b32.xlu1 %v1778_v1, %s1500_s27  ;;  %380 = vrot.lane.b32.xlu0 %v1778_v1, %s1501_s29  ;;  %s1516_s27 = smov 38   ;;  %s1517_s29 = smov 110  }
  0xb2   : > { %348 = vrot.lane.b32.xlu1 %v1778_v1, %s1502_s11  ;;  %585 = vrot.lane.b32.xlu0 %v1776_v0, %s1503_s12  ;;  %s1518_s11 = smov 46   ;;  %s1519_s12 = smov 96  }
  0xb6   : > { %553 = vrot.lane.b32.xlu1 %v1776_v0, %s1504_s6  ;;  %545 = vrot.lane.b32.xlu0 %v1776_v0, %s1505_s17  ;;  %s1520_s6 = smov 101   ;;  %s1521_s17 = smov 32  }
  0xba   : > { %424 = vrot.lane.b32.xlu1 %v1778_v1, %s1506_s0  ;;  %513 = vrot.lane.b32.xlu0 %v1776_v0, %s1507_s2  ;;  %s1522_s0 = smov 37   ;;  %s1523_s2 = smov 109  }
  0xbe   : > { %392 = vrot.lane.b32.xlu1 %v1778_v1, %s1508_s26  ;;  %384 = vrot.lane.b32.xlu0 %v1778_v1, %s1509_s28  ;;  %s1524_s26 = smov 45   ;;  %s1525_s28 = smov 95  }
  0xc2   : > { %352 = vrot.lane.b32.xlu1 %v1778_v1, %s1510_s10  ;;  %589 = vrot.lane.b32.xlu0 %v1776_v0, %s1511_s24  ;;  %s1526_s10 = smov 100   ;;  %s1527_s24 = smov 31  }
  0xc6   : > { %557 = vrot.lane.b32.xlu1 %v1776_v0, %s1512_s7  ;;  %549 = vrot.lane.b32.xlu0 %v1776_v0, %s1513_s13  ;;  %s1528_s7 = smov 36   ;;  %s1529_s13 = smov 108  }
  0xca   : > { %428 = vrot.lane.b32.xlu1 %v1778_v1, %s1514_s16  ;;  %517 = vrot.lane.b32.xlu0 %v1776_v0, %s1515_s23  ;;  %s1530_s16 = smov 44   ;;  %s1531_s23 = smov 94  }
  0xce   : > { %593 = vrot.lane.b32.xlu1 %v1776_v0, %s1516_s27  ;;  %396 = vrot.lane.b32.xlu0 %v1778_v1, %s1517_s29  ;;  %s1532_s27 = smov 99   ;;  %s1533_s29 = smov 30  }
  0xd2   : > { %561 = vrot.lane.b32.xlu1 %v1776_v0, %s1518_s11  ;;  %452 = vrot.lane.b32.xlu0 %v1778_v1, %s1519_s12  ;;  %s1534_s11 = smov 35   ;;  %s1535_s12 = smov 107  }
  0xd6   : > { %432 = vrot.lane.b32.xlu1 %v1778_v1, %s1520_s6  ;;  %617 = vrot.lane.b32.xlu0 %v1776_v0, %s1521_s17  ;;  %s1536_s6 = smov 43   ;;  %s1537_s17 = smov 93  }
  0xda   : > { %597 = vrot.lane.b32.xlu1 %v1776_v0, %s1522_s0  ;;  %400 = vrot.lane.b32.xlu0 %v1778_v1, %s1523_s2  ;;  %s1538_s0 = smov 98   ;;  %s1539_s2 = smov 29  }
  0xde   : > { %565 = vrot.lane.b32.xlu1 %v1776_v0, %s1524_s26  ;;  %456 = vrot.lane.b32.xlu0 %v1778_v1, %s1525_s28  ;;  %s1540_s26 = smov 34   ;;  %s1541_s28 = smov 106  }
  0xe2   : > { %436 = vrot.lane.b32.xlu1 %v1778_v1, %s1526_s10  ;;  %621 = vrot.lane.b32.xlu0 %v1776_v0, %s1527_s24  ;;  %s1542_s10 = smov 42   ;;  %s1543_s24 = smov 92  }
  0xe6   : > { %601 = vrot.lane.b32.xlu1 %v1776_v0, %s1528_s7  ;;  %404 = vrot.lane.b32.xlu0 %v1778_v1, %s1529_s13  ;;  %s1544_s7 = smov 97   ;;  %s1545_s13 = smov 28  }
  0xea   : > { %569 = vrot.lane.b32.xlu1 %v1776_v0, %s1530_s16  ;;  %460 = vrot.lane.b32.xlu0 %v1778_v1, %s1531_s23  ;;  %s1546_s16 = smov 33   ;;  %s1547_s23 = smov 105  }
  0xee   : > { %440 = vrot.lane.b32.xlu1 %v1778_v1, %s1532_s27  ;;  %625 = vrot.lane.b32.xlu0 %v1776_v0, %s1533_s29  ;;  %s1548_s27 = smov 41   ;;  %s1549_s29 = smov 91  }
  0xf0   : > { %v489_v3 = vpop.permute.xlu1 %488  ;;  %v357_v4 = vpop.permute.xlu0 %356 }
  0xf1   : > { %492 = vst.msk [vmem:[#allocation2] sm:$0xff] %vm491_vm1, %v489_v3 }
  0xf2   : > { %359 = vst.msk [vmem:[#allocation2 + $0x40] sm:$0xff] %vm326_vm0, %v357_v4  ;;  %605 = vrot.lane.b32.xlu1 %v1776_v0, %s1534_s11  ;;  %408 = vrot.lane.b32.xlu0 %v1778_v1, %s1535_s12  ;;  %s1550_s11 = smov 90   ;;  %s1551_s12 = smov 27   ;;  %v1298_v4 = vld [vmem:[#allocation8] ss:$20 sps:$4 sm:$0xff]  }
  0xf4   : > { %v361_v5 = vpop.permute.xlu1 %360  ;;  %v522_v6 = vpop.permute.xlu0 %521 }
  0xf5   : > { %363 = vst.msk [vmem:[#allocation2 + $0x48] sm:$0xff] %vm326_vm0, %v361_v5  ;;  %v1553_v5 = vmov 0.0  }
  0xf6   : > { %524 = vst.msk [vmem:[#allocation2 + $0x40] sm:$0xff] %vm491_vm1, %v522_v6  ;;  %573 = vrot.lane.b32.xlu1 %v1776_v0, %s1536_s6  ;;  %464 = vrot.lane.b32.xlu0 %v1778_v1, %s1537_s17  ;;  %s1552_s6 = smov 26   ;;  %s1555_s17 = smov 1  }
  0xf8   : > { %v526_v7 = vpop.permute.xlu1 %525  ;;  %v329_v8 = vpop.permute.xlu0 %328  ;;  %v651_v12 = vld [vmem:[#allocation2] sm:$0xff] }
  0xf9   : > { %528 = vst.msk [vmem:[#allocation2 + $0x48] sm:$0xff] %vm491_vm1, %v526_v7 }
  0xfa   : > { %331 = vst.msk [vmem:[#allocation2 + $0x8] sm:$0xff] %vm326_vm0, %v329_v8  ;;  %444 = vrot.lane.b32.xlu1 %v1778_v1, %s1538_s0  ;;  %629 = vrot.lane.b32.xlu0 %v1776_v0, %s1539_s2  ;;  %s1075_s0 = sshll.u32 %s1608_s22, 6 }
  0xfc   : > { %v365_v9 = vpop.permute.xlu1 %364  ;;  %v494_v10 = vpop.permute.xlu0 %493 }
  0xfd   : > { %367 = vst.msk [vmem:[#allocation2 + $0x50] sm:$0xff] %vm326_vm0, %v365_v9  ;;  %v659_v11 = vld [vmem:[#allocation2 + $0x40] sm:$0xff] }
  0xfe   : > { %496 = vst.msk [vmem:[#allocation2 + $0x8] sm:$0xff] %vm491_vm1, %v494_v10  ;;  %1080 = vmatprep.subr.bf16.mxu0 %v659_v11  ;;  %609 = vrot.lane.b32.xlu1 %v1776_v0, %s1540_s26 }
  0xff   : > { %412 = vrot.lane.b32.xlu0 %v1778_v1, %s1541_s28  ;;  %1081 = vmatpush3.bf16.msra.mxu0 %v651_v12  ;;  %s1953_s28 = scalar_lea.hbm %s2002_s3, %s1075_s0 }
 0x100   : > { %v530_v13 = vpop.permute.xlu1 %529  ;;  %v660_v14 = vld [vmem:[#allocation2 + $0x48] sm:$0xff]  ;;  %v333_v15 = vpop.permute.xlu0 %332 }
 0x101   : > { %532 = vst.msk [vmem:[#allocation2 + $0x50] sm:$0xff] %vm491_vm1, %v530_v13  ;;  %1082 = vmatprep.subr.bf16.mxu0 %v660_v14 }
 0x102   : > { %335 = vst.msk [vmem:[#allocation2 + $0x10] sm:$0xff] %vm326_vm0, %v333_v15  ;;  %577 = vrot.lane.b32.xlu1 %v1776_v0, %s1542_s10 }
 0x103   : > { %468 = vrot.lane.b32.xlu0 %v1778_v1, %s1543_s24  ;;  %s870_s24 = scalar_lea.sflag [#allocation5], %s1756_s8 }
 0x104   : > { %v369_v16 = vpop.permute.xlu1 %368  ;;  %v498_v17 = vpop.permute.xlu0 %497 }
 0x105   : > { %371 = vst.msk [vmem:[#allocation2 + $0x58] sm:$0xff] %vm326_vm0, %v369_v16  ;;  %v652_v18 = vld [vmem:[#allocation2 + $0x8] sm:$0xff] }
 0x106   : > { %500 = vst.msk [vmem:[#allocation2 + $0x10] sm:$0xff] %vm491_vm1, %v498_v17  ;;  %1083 = vmatpush3.bf16.msra.mxu0 %v652_v18  ;;  %448 = vrot.lane.b32.xlu1 %v1778_v1, %s1544_s7 }
 0x107   : > { %633 = vrot.lane.b32.xlu0 %v1776_v0, %s1545_s13  ;;  %s1556_s13 = smov [#allocation9]  }
 0x108   : > { %v534_v19 = vpop.permute.xlu1 %533  ;;  %v661_v20 = vld [vmem:[#allocation2 + $0x50] sm:$0xff]  ;;  %v337_v21 = vpop.permute.xlu0 %336 }
 0x109   : > { %536 = vst.msk [vmem:[#allocation2 + $0x58] sm:$0xff] %vm491_vm1, %v534_v19  ;;  %1084 = vmatprep.subr.bf16.mxu0 %v661_v20 }
 0x10a   : > { %339 = vst.msk [vmem:[#allocation2 + $0x18] sm:$0xff] %vm326_vm0, %v337_v21  ;;  %613 = vrot.lane.b32.xlu1 %v1776_v0, %s1546_s16  ;;  %s1397_s16 = sshll.u32 %s1556_s13, 4  ;;  %s1398_s16 = int_to_ptr.vmem [resolvable:$false] %s1397_s16 }
 0x10b   : > { %416 = vrot.lane.b32.xlu0 %v1778_v1, %s1547_s23  ;;  %s1399_s23 = scalar_lea.vmem %s1398_s16, 128 }
 0x10c   : > { %v373_v23 = vpop.permute.xlu1 %372  ;;  %v502_v24 = vpop.permute.xlu0 %501 }
 0x10d   : > { %375 = vst.msk [vmem:[#allocation2 + $0x60] sm:$0xff] %vm326_vm0, %v373_v23  ;;  %v653_v25 = vld [vmem:[#allocation2 + $0x10] sm:$0xff] }
 0x10e   : > { %504 = vst.msk [vmem:[#allocation2 + $0x18] sm:$0xff] %vm491_vm1, %v502_v24  ;;  %1085 = vmatpush3.bf16.msra.mxu0 %v653_v25  ;;  %581 = vrot.lane.b32.xlu1 %v1776_v0, %s1548_s27 }
 0x10f   : > { %472 = vrot.lane.b32.xlu0 %v1778_v1, %s1549_s29 }
 0x110   : > { %v538_v26 = vpop.permute.xlu1 %537  ;;  %v662_v27 = vld [vmem:[#allocation2 + $0x58] sm:$0xff]  ;;  %v341_v28 = vpop.permute.xlu0 %340 }
 0x111   : > { %540 = vst.msk [vmem:[#allocation2 + $0x60] sm:$0xff] %vm491_vm1, %v538_v26  ;;  %1086 = vmatprep.subr.bf16.mxu0 %v662_v27 }
 0x112   : > { %343 = vst.msk [vmem:[#allocation2 + $0x20] sm:$0xff] %vm326_vm0, %v341_v28  ;;  %476 = vrot.lane.b32.xlu1 %v1778_v1, %s1550_s11 }
 0x113   : > { %637 = vrot.lane.b32.xlu0 %v1776_v0, %s1551_s12 }
 0x114   : > { %v377_v29 = vpop.permute.xlu1 %376  ;;  %v506_v30 = vpop.permute.xlu0 %505 }
 0x115   : > { %379 = vst.msk [vmem:[#allocation2 + $0x68] sm:$0xff] %vm326_vm0, %v377_v29  ;;  %v654_v31 = vld [vmem:[#allocation2 + $0x18] sm:$0xff] }
 0x116   : > { %508 = vst.msk [vmem:[#allocation2 + $0x20] sm:$0xff] %vm491_vm1, %v506_v30  ;;  %1087 = vmatpush3.bf16.msra.mxu0 %v654_v31 }
 0x117   : > { %641 = vrot.lane.b32.xlu0 %v1776_v0, %s1552_s6 }
 0x118   : > { %v542_v32 = vpop.permute.xlu1 %541  ;;  %v663_v33 = vld [vmem:[#allocation2 + $0x60] sm:$0xff]  ;;  %v345_v34 = vpop.permute.xlu0 %344 }
 0x119   : > { %544 = vst.msk [vmem:[#allocation2 + $0x68] sm:$0xff] %vm491_vm1, %v542_v32  ;;  %1088 = vmatprep.subr.bf16.mxu0 %v663_v33 }
 0x11a   : > { %347 = vst.msk [vmem:[#allocation2 + $0x28] sm:$0xff] %vm326_vm0, %v345_v34 }
 0x11c   : > { %v421_v35 = vpop.permute.xlu1 %420  ;;  %v510_v36 = vpop.permute.xlu0 %509 }
 0x11d   : > { %423 = vst.msk [vmem:[#allocation2 + $0xc0] sm:$0xff] %vm326_vm0, %v421_v35  ;;  %v655_v37 = vld [vmem:[#allocation2 + $0x20] sm:$0xff] }
 0x11e   : > { %512 = vst.msk [vmem:[#allocation2 + $0x28] sm:$0xff] %vm491_vm1, %v510_v36  ;;  %1089 = vmatpush3.bf16.msra.mxu0 %v655_v37 }
 0x120   : > { %v389_v38 = vpop.permute.xlu1 %388  ;;  %v664_v39 = vld [vmem:[#allocation2 + $0x68] sm:$0xff]  ;;  %v381_v40 = vpop.permute.xlu0 %380 }
 0x121   : > { %391 = vst.msk [vmem:[#allocation2 + $0x80] sm:$0xff] %vm326_vm0, %v389_v38  ;;  %1090 = vmatprep.subr.bf16.mxu0 %v664_v39  ;;  %383 = vst.msk [vmem:[#allocation2 + $0x70] sm:$0xff] %vm326_vm0, %v381_v40 }
 0x124   : > { %v349_v41 = vpop.permute.xlu1 %348  ;;  %v586_v42 = vpop.permute.xlu0 %585 }
 0x125   : > { %351 = vst.msk [vmem:[#allocation2 + $0x30] sm:$0xff] %vm326_vm0, %v349_v41  ;;  %v656_v43 = vld [vmem:[#allocation2 + $0x28] sm:$0xff] }
 0x126   : > { %588 = vst.msk [vmem:[#allocation2 + $0xc0] sm:$0xff] %vm491_vm1, %v586_v42  ;;  %1091 = vmatpush3.bf16.msra.mxu0 %v656_v43 }
 0x128   : > { %v554_v44 = vpop.permute.xlu1 %553  ;;  %v546_v45 = vpop.permute.xlu0 %545 }
 0x129   : > { %556 = vst.msk [vmem:[#allocation2 + $0x80] sm:$0xff] %vm491_vm1, %v554_v44  ;;  %548 = vst.msk [vmem:[#allocation2 + $0x70] sm:$0xff] %vm491_vm1, %v546_v45 }
 0x12c   : > { %v425_v46 = vpop.permute.xlu1 %424  ;;  %v514_v47 = vpop.permute.xlu0 %513 }
 0x12d   : > { %427 = vst.msk [vmem:[#allocation2 + $0xc8] sm:$0xff] %vm326_vm0, %v425_v46  ;;  %v675_v48 = vld [vmem:[#allocation2 + $0xc0] sm:$0xff] }
 0x12e   : > { %516 = vst.msk [vmem:[#allocation2 + $0x30] sm:$0xff] %vm491_vm1, %v514_v47  ;;  %1102 = vmatprep.subr.bf16.mxu1 %v675_v48 }
 0x130   : > { %v393_v49 = vpop.permute.xlu1 %392  ;;  %v667_v50 = vld [vmem:[#allocation2 + $0x80] sm:$0xff]  ;;  %v385_v51 = vpop.permute.xlu0 %384  ;;  %v665_v52 = vld [vmem:[#allocation2 + $0x70] sm:$0xff] }
 0x131   : > { %395 = vst.msk [vmem:[#allocation2 + $0x88] sm:$0xff] %vm326_vm0, %v393_v49  ;;  %1103 = vmatpush3.bf16.msra.mxu1 %v667_v50  ;;  %387 = vst.msk [vmem:[#allocation2 + $0x78] sm:$0xff] %vm326_vm0, %v385_v51  ;;  %1092 = vmatprep.subr.bf16.mxu0 %v665_v52 }
 0x134   : > { %v353_v53 = vpop.permute.xlu1 %352  ;;  %v590_v54 = vpop.permute.xlu0 %589 }
 0x135   : > { %355 = vst.msk [vmem:[#allocation2 + $0x38] sm:$0xff] %vm326_vm0, %v353_v53  ;;  %v657_v55 = vld [vmem:[#allocation2 + $0x30] sm:$0xff] }
 0x136   : > { %592 = vst.msk [vmem:[#allocation2 + $0xc8] sm:$0xff] %vm491_vm1, %v590_v54  ;;  %1093 = vmatpush3.bf16.msra.mxu0 %v657_v55  ;;  %v1301_v55 = vld [vmem:[#allocation8 + $0x8] ss:$20 sps:$4 sm:$0xff]  }
 0x138   : > { %v558_v56 = vpop.permute.xlu1 %557  ;;  %v550_v57 = vpop.permute.xlu0 %549 }
 0x139   : > { %560 = vst.msk [vmem:[#allocation2 + $0x88] sm:$0xff] %vm491_vm1, %v558_v56  ;;  %552 = vst.msk [vmem:[#allocation2 + $0x78] sm:$0xff] %vm491_vm1, %v550_v57 }
 0x13c   : > { %v429_v58 = vpop.permute.xlu1 %428  ;;  %v518_v59 = vpop.permute.xlu0 %517 }
 0x13d   : > { %431 = vst.msk [vmem:[#allocation2 + $0xd0] sm:$0xff] %vm326_vm0, %v429_v58  ;;  %v676_v60 = vld [vmem:[#allocation2 + $0xc8] sm:$0xff] }
 0x13e   : > { %520 = vst.msk [vmem:[#allocation2 + $0x38] sm:$0xff] %vm491_vm1, %v518_v59  ;;  %1104 = vmatprep.subr.bf16.mxu1 %v676_v60  ;;  %v1304_v59 = vld [vmem:[#allocation8 + $0x10] ss:$20 sps:$4 sm:$0xff]   ;;  %v842_v60 = vld [vmem:[%s1766_s14] sm:$0x3]  ;;  %s1061_s14 = sshll.u32 %s1756_s8, 2 }
 0x140   : > { %v594_v61 = vpop.permute.xlu1 %593  ;;  %v668_v62 = vld [vmem:[#allocation2 + $0x88] sm:$0xff]  ;;  %v397_v63 = vpop.permute.xlu0 %396  ;;  %v666_v0 = vld [vmem:[#allocation2 + $0x78] sm:$0xff] }
 0x141   : > { %596 = vst.msk [vmem:[#allocation2 + $0xd0] sm:$0xff] %vm491_vm1, %v594_v61  ;;  %1105 = vmatpush3.bf16.msra.mxu1 %v668_v62  ;;  %1094 = vmatprep.subr.bf16.mxu0 %v666_v0  ;;  %v843_v61 = vunpack.c.0.s8 %v842_v60 }
 0x142   : > { %399 = vst.msk [vmem:[#allocation2 + $0x90] sm:$0xff] %vm326_vm0, %v397_v63 }
 0x143   : > { %844 = vrot.lane.b32.xlu1 %v843_v61, %s1555_s17  ;;  %vm854_vm5 = vcmp.eq.s32.totalorder %v843_v61, 1 }
 0x144   : > { %v562_v1 = vpop.permute.xlu1 %561  ;;  %v453_v2 = vpop.permute.xlu0 %452 }
 0x145   : > { %564 = vst.msk [vmem:[#allocation2 + $0x90] sm:$0xff] %vm491_vm1, %v562_v1  ;;  %v658_v3 = vld [vmem:[#allocation2 + $0x38] sm:$0xff] }
 0x146   : > { %455 = vst.msk [vmem:[#allocation2 + $0x100] sm:$0xff] %vm326_vm0, %v453_v2  ;;  %1095 = vmatpush3.bf16.msra.mxu0 %v658_v3 }
 0x147   : > { %1132 = vmatprep.subr.bf16.mxu0 %v1553_v5  ;;  %848 = vrot.lane.b32.xlu1 %v843_v61, %s1481_s15 }
 0x148   : > { %v433_v6 = vpop.permute.xlu1 %432  ;;  %v677_v7 = vld [vmem:[#allocation2 + $0xd0] sm:$0xff]  ;;  %v618_v8 = vpop.permute.xlu0 %617 }
 0x149   : > { %435 = vst.msk [vmem:[#allocation2 + $0xd8] sm:$0xff] %vm326_vm0, %v433_v6  ;;  %1106 = vmatprep.subr.bf16.mxu1 %v677_v7  ;;  %752 = vmatmul.mubr.bf16.vlgmr.msra.gmra.mrb[0].mxu0 %v1298_v4 }
 0x14a   : > { %620 = vst.msk [vmem:[#allocation2 + $0x100] sm:$0xff] %vm491_vm1, %v618_v8  ;;  %1146 = vmatprep.mubr.msk.bf16.mxu0 %vm1554_vm2, %v1553_v5 }
 0x14c   : > { %v598_v9 = vpop.permute.xlu1 %597  ;;  %v669_v10 = vld [vmem:[#allocation2 + $0x90] sm:$0xff]  ;;  %v401_v11 = vpop.permute.xlu0 %400 }
 0x14d   : > { %600 = vst.msk [vmem:[#allocation2 + $0xd8] sm:$0xff] %vm491_vm1, %v598_v9  ;;  %1107 = vmatpush3.bf16.msra.mxu1 %v669_v10 }
 0x14e   : > { %403 = vst.msk [vmem:[#allocation2 + $0x98] sm:$0xff] %vm326_vm0, %v401_v11 }
 0x150   : > { %v566_v12 = vpop.permute.xlu1 %565  ;;  %v457_v13 = vpop.permute.xlu0 %456 }
 0x151   : > { %568 = vst.msk [vmem:[#allocation2 + $0x98] sm:$0xff] %vm491_vm1, %v566_v12  ;;  %v683_v14 = vld [vmem:[#allocation2 + $0x100] sm:$0xff] }
 0x152   : > { %459 = vst.msk [vmem:[#allocation2 + $0x108] sm:$0xff] %vm326_vm0, %v457_v13  ;;  %1133 = vmatpush3.bf16.msra.mxu0 %v683_v14 }
 0x153   : > { %1134 = vmatprep.subr.bf16.mxu0 %v1553_v5 }
 0x154   : > { %v437_v15 = vpop.permute.xlu1 %436  ;;  %v678_v16 = vld [vmem:[#allocation2 + $0xd8] sm:$0xff]  ;;  %v622_v17 = vpop.permute.xlu0 %621 }
 0x155   : > { %439 = vst.msk [vmem:[#allocation2 + $0xe0] sm:$0xff] %vm326_vm0, %v437_v15  ;;  %1108 = vmatprep.subr.bf16.mxu1 %v678_v16 }
 0x156   : > { %624 = vst.msk [vmem:[#allocation2 + $0x108] sm:$0xff] %vm491_vm1, %v622_v17 }
 0x158   : > { %v602_v18 = vpop.permute.xlu1 %601  ;;  %v670_v19 = vld [vmem:[#allocation2 + $0x98] sm:$0xff]  ;;  %v405_v20 = vpop.permute.xlu0 %404 }
 0x159   : > { %604 = vst.msk [vmem:[#allocation2 + $0xe0] sm:$0xff] %vm491_vm1, %v602_v18  ;;  %1109 = vmatpush3.bf16.msra.mxu1 %v670_v19 }
 0x15a   : > { %407 = vst.msk [vmem:[#allocation2 + $0xa0] sm:$0xff] %vm326_vm0, %v405_v20 }
 0x15c   : > { %v570_v21 = vpop.permute.xlu1 %569  ;;  %v461_v22 = vpop.permute.xlu0 %460 }
 0x15d   : > { %572 = vst.msk [vmem:[#allocation2 + $0xa0] sm:$0xff] %vm491_vm1, %v570_v21  ;;  %v684_v23 = vld [vmem:[#allocation2 + $0x108] sm:$0xff] }
 0x15e   : > { %463 = vst.msk [vmem:[#allocation2 + $0x110] sm:$0xff] %vm326_vm0, %v461_v22  ;;  %1135 = vmatpush3.bf16.msra.mxu0 %v684_v23 }
 0x15f   : > { %1136 = vmatprep.subr.bf16.mxu0 %v1553_v5 }
 0x160   : > { %v441_v24 = vpop.permute.xlu1 %440  ;;  %v679_v25 = vld [vmem:[#allocation2 + $0xe0] sm:$0xff]  ;;  %v626_v26 = vpop.permute.xlu0 %625 }
 0x161   : > { %443 = vst.msk [vmem:[#allocation2 + $0xe8] sm:$0xff] %vm326_vm0, %v441_v24  ;;  %1110 = vmatprep.subr.bf16.mxu1 %v679_v25 }
 0x162   : > { %628 = vst.msk [vmem:[#allocation2 + $0x110] sm:$0xff] %vm491_vm1, %v626_v26 }
 0x164   : > { %v606_v27 = vpop.permute.xlu1 %605  ;;  %v671_v28 = vld [vmem:[#allocation2 + $0xa0] sm:$0xff]  ;;  %v409_v29 = vpop.permute.xlu0 %408 }
 0x165   : > { %608 = vst.msk [vmem:[#allocation2 + $0xe8] sm:$0xff] %vm491_vm1, %v606_v27  ;;  %1111 = vmatpush3.bf16.msra.mxu1 %v671_v28 }
 0x166   : > { %411 = vst.msk [vmem:[#allocation2 + $0xa8] sm:$0xff] %vm326_vm0, %v409_v29 }
 0x168   : > { %v574_v30 = vpop.permute.xlu1 %573  ;;  %v465_v31 = vpop.permute.xlu0 %464 }
 0x169   : > { %576 = vst.msk [vmem:[#allocation2 + $0xa8] sm:$0xff] %vm491_vm1, %v574_v30  ;;  %v685_v32 = vld [vmem:[#allocation2 + $0x110] sm:$0xff] }
 0x16a   : > { %467 = vst.msk [vmem:[#allocation2 + $0x118] sm:$0xff] %vm326_vm0, %v465_v31  ;;  %1137 = vmatpush3.bf16.msra.mxu0 %v685_v32 }
 0x16b   : > { %1138 = vmatprep.subr.bf16.mxu0 %v1553_v5 }
 0x16c   : > { %v445_v33 = vpop.permute.xlu1 %444  ;;  %v680_v34 = vld [vmem:[#allocation2 + $0xe8] sm:$0xff]  ;;  %v630_v35 = vpop.permute.xlu0 %629 }
 0x16d   : > { %447 = vst.msk [vmem:[#allocation2 + $0xf0] sm:$0xff] %vm326_vm0, %v445_v33  ;;  %1112 = vmatprep.subr.bf16.mxu1 %v680_v34 }
 0x16e   : > { %632 = vst.msk [vmem:[#allocation2 + $0x118] sm:$0xff] %vm491_vm1, %v630_v35 }
 0x170   : > { %v610_v36 = vpop.permute.xlu1 %609  ;;  %v672_v37 = vld [vmem:[#allocation2 + $0xa8] sm:$0xff] }
 0x171   : > { %612 = vst.msk [vmem:[#allocation2 + $0xf0] sm:$0xff] %vm491_vm1, %v610_v36  ;;  %v413_v38 = vpop.permute.xlu0 %412  ;;  %1113 = vmatpush3.bf16.msra.mxu1 %v672_v37 }
 0x172   : > { %415 = vst.msk [vmem:[#allocation2 + $0xb0] sm:$0xff] %vm326_vm0, %v413_v38 }
 0x174   : > { %v578_v39 = vpop.permute.xlu1 %577 }
 0x175   : > { %580 = vst.msk [vmem:[#allocation2 + $0xb0] sm:$0xff] %vm491_vm1, %v578_v39  ;;  %v469_v40 = vpop.permute.xlu0 %468  ;;  %v686_v41 = vld [vmem:[#allocation2 + $0x118] sm:$0xff] }
 0x176   : > { %471 = vst.msk [vmem:[#allocation2 + $0x120] sm:$0xff] %vm326_vm0, %v469_v40  ;;  %1139 = vmatpush3.bf16.msra.mxu0 %v686_v41 }
 0x177   : > { %1140 = vmatprep.subr.bf16.mxu0 %v1553_v5 }
 0x178   : > { %v449_v42 = vpop.permute.xlu1 %448  ;;  %v681_v43 = vld [vmem:[#allocation2 + $0xf0] sm:$0xff] }
 0x179   : > { %451 = vst.msk [vmem:[#allocation2 + $0xf8] sm:$0xff] %vm326_vm0, %v449_v42  ;;  %v634_v44 = vpop.permute.xlu0 %633  ;;  %1114 = vmatprep.subr.bf16.mxu1 %v681_v43 }
 0x17a   : > { %636 = vst.msk [vmem:[#allocation2 + $0x120] sm:$0xff] %vm491_vm1, %v634_v44 }
 0x17c   : > { %v614_v45 = vpop.permute.xlu1 %613  ;;  %v673_v46 = vld [vmem:[#allocation2 + $0xb0] sm:$0xff] }
 0x17d   : > { %616 = vst.msk [vmem:[#allocation2 + $0xf8] sm:$0xff] %vm491_vm1, %v614_v45  ;;  %v417_v47 = vpop.permute.xlu0 %416  ;;  %1115 = vmatpush3.bf16.msra.mxu1 %v673_v46 }
 0x17e   : > { %419 = vst.msk [vmem:[#allocation2 + $0xb8] sm:$0xff] %vm326_vm0, %v417_v47 }
 0x180   : > { %v582_v48 = vpop.permute.xlu1 %581 }
 0x181   : > { %584 = vst.msk [vmem:[#allocation2 + $0xb8] sm:$0xff] %vm491_vm1, %v582_v48  ;;  %v473_v49 = vpop.permute.xlu0 %472  ;;  %v687_v50 = vld [vmem:[#allocation2 + $0x120] sm:$0xff] }
 0x182   : > { %475 = vst.msk [vmem:[#allocation2 + $0x128] sm:$0xff] %vm326_vm0, %v473_v49  ;;  %1141 = vmatpush3.bf16.msra.mxu0 %v687_v50 }
 0x183   : > { %1142 = vmatprep.subr.bf16.mxu0 %v1553_v5 }
 0x184   : > { %v477_v51 = vpop.permute.xlu1 %476  ;;  %v682_v52 = vld [vmem:[#allocation2 + $0xf8] sm:$0xff] }
 0x185   : > { %v638_v53 = vpop.permute.xlu0 %637  ;;  %479 = vst.msk [vmem:[#allocation2 + $0x130] sm:$0xff] %vm326_vm0, %v477_v51  ;;  %1116 = vmatprep.subr.bf16.mxu1 %v682_v52 }
 0x186   : > { %640 = vst.msk [vmem:[#allocation2 + $0x128] sm:$0xff] %vm491_vm1, %v638_v53 }
 0x188   : > { %v674_v54 = vld [vmem:[#allocation2 + $0xb8] sm:$0xff] }
 0x189   : > { %v642_v56 = vpop.permute.xlu0 %641  ;;  %1117 = vmatpush3.bf16.msra.mxu1 %v674_v54 }
 0x18a   : > { %644 = vst.msk [vmem:[#allocation2 + $0x130] sm:$0xff] %vm491_vm1, %v642_v56 }
 0x18c   : > { %793 = vmatmul.mubr.bf16.vlgmr.msra.gmra.mrb[0].mxu1 %v1301_v55 }
 0x18d   : > { %v688_v57 = vld [vmem:[#allocation2 + $0x128] sm:$0xff] }
 0x18e   : > { %1143 = vmatpush3.bf16.msra.mxu0 %v688_v57 }
 0x18f   : > { %1144 = vmatprep.subr.bf16.mxu0 %v1553_v5 }
 0x191   : > { %v689_v58 = vld [vmem:[#allocation2 + $0x130] sm:$0xff] }
 0x192   : > { %1145 = vmatpush3.bf16.msra.mxu0 %v689_v58 }
 0x195   : > { %1147 = vmatmul.mubr.msk.bf16.vlgmr.msra.gmra.mrb[4].mxu0 %vm715_vm3, %v1304_v59 }
 0x1b5   : > { %v845_v18 = vpop.permute.xlu1 %844 }
 0x1b6   : > { %vm852_vm4 = vcmp.eq.s32.totalorder %v845_v18, 2 }
 0x1b9   : > { %v849_v19 = vpop.permute.xlu1 %848 }
 0x1ba   : > { %vm856_vm6 = vcmp.eq.s32.totalorder %v849_v19, 0 }
 0x21c   : > { %v1096_v62 = vpop.f32.mrb[0].mxu0 }
 0x21d   : > { %v1097_v63 = vpop.f32.mrb[1].mxu0 }
 0x21e   : > { %v1098_v0 = vadd.f32 %v1097_v63, %v1096_v62  ;;  %v1099_v1 = vpop.f32.mrb[2].mxu0 }
 0x21f   : > { %v1100_v2 = vpop.f32.mrb[3].mxu0 }
 0x220   : > { %v1101_v3 = vadd.f32 %v1100_v2, %v1099_v1 }
 0x25f   : > { %v1118_v4 = vpop.f32.mrb[0].mxu1 }
 0x260   : > { %v1119_v6 = vpop.f32.mrb[1].mxu1 }
 0x261   : > { %v1120_v5 = vadd.f32 %v1119_v6, %v1118_v4  ;;  %v1121_v7 = vpop.f32.mrb[2].mxu1 }
 0x262   : > { %v1122_v8 = vpop.f32.mrb[3].mxu1 }
 0x263   : > { %v1123_v9 = vadd.f32 %v1122_v8, %v1121_v7  ;;  %v795_v10 = vadd.f32 %v1120_v5, %v1098_v0 }
 0x265   : > { %v798_v11 = vadd.f32 %v1123_v9, %v1101_v3 }
 0x268   : > { %v835_v12 = vpop.f32.mrb[4].mxu0 }
 0x269   : > { %v836_v13 = vadd.f32 %v835_v12, %v795_v10  ;;  %v1148_v14 = vpop.f32.mrb[5].mxu0 }
 0x26a   : > { %v838_v15 = vpop.f32.mrb[6].mxu0 }
 0x26b   : > { %v839_v16 = vadd.f32 %v838_v15, %v798_v11  ;;  %v1149_v17 = vpop.f32.mrb[7].mxu0 }
 0x26d   : > { %846 = vrot.lane.b32.xlu0 %v839_v16, %s1555_s17 }
 0x271   : > { %850 = vrot.lane.b32.xlu0 %v839_v16, %s1481_s15  ;;  %s295_s15 = scalar_lea.vmem [#allocation9], %s1061_s14 }
 0x272   : > { %s891_s10 = sshll.u32 %s295_s15, 4  ;;  %s892_s10 = int_to_ptr.vmem [resolvable:$true] %s891_s10 }
 0x273   : > { %s1393_s7 = scalar_lea.vmem %s892_s10, 64  ;;  %p1400_p9 = scmp.lt.s32.totalorder %s892_s10, %s1398_s16 }
 0x274   : > { %p1394_p10 = scmp.ne.s32.totalorder %s892_s10, %s1393_s7  ;;  %p1401_p2 = scmp.lt.s32.totalorder %s1399_s23, %s1393_s7 }
 0x276   : > { %p1395_p3 = pnand %p1394_p10, %p2025_p13  ;;  %p1402_p5 = por %p1401_p2, %p1400_p9 }
 0x278   : > { %p1396_p7 = pneg %p1395_p3 }
 0x27a   : > { %p1403_p1 = pnand %p1402_p5, %p1396_p7 }
 0x2df   : > { %v847_v20 = vpop.permute.xlu0 %846 }
 0x2e0   : > { %v853_v21 = vsel %vm852_vm4, %v847_v20, 0.0 }
 0x2e1   : > { %v855_v22 = vsel %vm854_vm5, %v839_v16, %v853_v21 }
 0x2e3   : > { %v851_v23 = vpop.permute.xlu0 %850 }
 0x2e4   : > { %v857_v24 = vsel %vm856_vm6, %v851_v23, %v855_v22 }
 0x2e5   : > { %v858_v25 = vadd.f32 %v857_v24, %v836_v13 }
 0x2e7   : > { %v859_v26 = vpack.c.bf16 %v858_v25, %v858_v25  ;;  %861 = vadd.xlane.f32.xlu1 %v858_v25  ;;  %v865_v27 = vmul.f32 %v858_v25, %v858_v25 }
 0x2e9   : > { %866 = vadd.xlane.f32.xlu0 %v865_v27  ;;  %860 = vst [vmem:[%s295_s15] sm:$0xf] %v859_v26 }
 0x2ea   : > { %1406 = shalt.err (!%p1403_p1)
}
 0x2eb   : > { %s1407_s8 = scalar_lea.hbm %s1953_s28, 64  ;;  %s1411_s11 = scalar_lea.hbm %s2002_s3, 128 }
 0x2ec   : > { %p1408_p6 = scmp.ne.s32.totalorder %s1953_s28, %s1407_s8  ;;  %p1412_p0 = scmp.lt.u32.totalorder %s1953_s28, %s2002_s3 }
 0x2ed   : > { %p1413_p12 = scmp.lt.u32.totalorder %s1411_s11, %s1407_s8  ;;  %p1415_p10 = scmp.lt.u32.totalorder %s1407_s8, %s1953_s28 }
 0x2ee   : > { %p1409_p8 = pnand %p1408_p6, %p2025_p13 }
 0x2ef   : > { %p1414_p11 = por %p1413_p12, %p1412_p0 }
 0x2f0   : > { %p1410_p4 = pneg %p1409_p8 }
 0x2f1   : > { %p1416_p3 = por %p1415_p10, %p1414_p11 }
 0x2f3   : > { %p1417_p7 = pnand %p1416_p3, %p1410_p4 }
 0x2f5   : > { %1420 = shalt.err (!%p1417_p7)
}
 0x2f6   : > { %1158 = dma.vmem_to_hbm [thread:$0]  (%p2025_p13), %s892_s10, 64, %s1953_s28, %s870_s24   ;;  %vm863_vm7 = vcmask 7168  }
 0x2f7   : > { %p309_p9 = scmp.lt.s32.totalorder %s1608_s22, 1 }
 0x2f9   : > { %s2034_s22 = smov (!%p309_p9, %s1608_s22), 1 }
 0x2fa   : > { %s1062_s17 = sshll.u32 %s2034_s22, 3 }
 0x2fb   : > { %s312_s0 = scalar_lea.vmem %s2003_s4, %s1062_s17  ;;  %s316_s7 = scalar_lea.vmem %s2004_s5, %s1062_s17 }
 0x374   : > { %v862_v28 = vpop.xlane.xlu1 %861 }
 0x375   : > { %864 = vst.msk [vmem:[%s312_s0] sm:$0xff] %vm863_vm7, %v862_v28 }
 0x376   : > { %v867_v29 = vpop.xlane.xlu0 %866 }
 0x377   : > { %868 = vst.msk [vmem:[%s316_s7] sm:$0xff] %vm863_vm7, %v867_v29 }
 0x378 PF: > { %s909_s9 = sand.u32 1, %s1455_s18   ;;  %p2026_p13 = scmp.ne.s32.totalorder %s2012_s25, 0 }
 0x379   : > { %p2027_p2 = scmp.ge.s32.totalorder %s1467_s21, 2  ;;  %s910_s22 = scalar_lea.sflag [#allocation5], %s909_s9 }
 0x37b   : > { %p1172_p5 = pnand %p2027_p2, %p2026_p13 }
 0x37d   : > { %1450 = dma.done.wait (!%p1172_p5), %s910_s22, 64  }
 0x37e   : > { %1452 = vsyncadd (!%p1172_p5), %s910_s22, 4294967232  ;;  %s2028_s28 = sld [smem:[#allocation14_spill]]  ;;  %p22_p1 = scmp.ge.s32.totalorder %s1643_s30, 4  }
 0x37f   : > { %s2029_s18 = smov %s1459_s19  ;;  %s2030_s19 = smov %s1463_s20 }
 0x380   : > { %s2032_s21 = smov %s1643_s30  ;;  %24 = sbr.rel (!%p22_p1) target bundleno = 10 (0xa), region = 119 }
 0x384   : > { %s2031_s20 = smov %s2028_s28 }
 0x387   :  { %929 = vsyncpa [#allocation4], 1 }
 0x388   :  { %931 = vsyncpa [#allocation4 + $0x1], 1 }
 0x389   :  { %932 = vsyncpa [#allocation7], 1 }
 0x38a   :  { %934 = vsyncpa [#allocation7 + $0x1], 1 }
 0x38b   :  { %935 = vsyncpa [#allocation5], 1 }
 0x38c   :  { %937 = vsyncpa [#allocation5 + $0x1], 1 }

</bundles_post_ra>
